<compile_context>
chip_gen: v7x
topology: tpu7x:2x2x1
jax: 0.10.0
libtpu: 0.0.40
codegen_flags: <defaults>
</compile_context>

<pallas_src>
import jax
import jax.numpy as jnp
import numpy as np
from jax.experimental import pallas as pl
from jax.experimental.pallas import tpu as pltpu


# ----------------------------- Pallas kernels -------------------------------

def gat_core_kernel(x_ref, adj_ref, w_ref, a_sd_ref, b_ref, core_ref):
    """All H heads of GraphAttentionLayer up to `matmul(attn, h) + b`, one batch.

    Heads are packed: one (N,D)x(D,H*O) matmul projects all heads; a single
    (H*O,2H) block-diagonal matmul produces per-head src/dst scores.  Output
    is written as core[h, b] so the PyTorch transpose/view quirk becomes a
    free row-major reshape outside the kernel.
    """
    H, _, N, O = core_ref.shape
    x = x_ref[0]                                                     # (N, D)
    adj = adj_ref[0]                                                 # (N, N)
    h_all = jnp.dot(x, w_ref[...], preferred_element_type=jnp.float32)    # (N, H*O)
    th = jnp.tanh(h_all)
    sd = jnp.dot(th, a_sd_ref[...], preferred_element_type=jnp.float32)   # (N, 2H)
    for h in range(H):                                               # static unroll
        s = sd[:, h:h + 1]                                           # (N, 1)
        d = sd[:, H + h:H + h + 1]                                   # (N, 1)
        attn = s + d.T                                               # (N, N)
        attn = jnp.where(attn >= 0.0, attn, 0.2 * attn)              # leaky_relu(0.2)
        attn = jnp.where(adj > 0.0, attn, -1e20)                     # masked_fill_
        attn = attn - jnp.max(attn, axis=-1, keepdims=True)          # softmax
        e = jnp.exp(attn)
        p = e * pl.reciprocal(jnp.sum(e, axis=-1, keepdims=True), approx=True)
        ctx = jnp.dot(p, h_all[:, h * O:(h + 1) * O],
                      preferred_element_type=jnp.float32) + b_ref[...]
        core_ref[h, 0, :, :] = ctx


def gat_gate_kernel(x_ref, agg_ref, hw_ref, hb_ref, out_ref):
    """ELU on the aggregated heads, sigmoid gate (Linear H), gated residual."""
    x = x_ref[0]                                                     # (N, D)
    agg = agg_ref[0]                                                 # (N, D)
    agg = jnp.where(agg > 0.0, agg, jnp.exp(jnp.minimum(agg, 0.0)) - 1.0)   # ELU
    z = jnp.dot(x, hw_ref[...], preferred_element_type=jnp.float32) + hb_ref[...]
    gate = pl.reciprocal(1.0 + jnp.exp(-z), approx=True)             # sigmoid
    out_ref[...] = (gate * agg + (1.0 - gate) * x)[None]


def gat_gate_heads_kernel(x_ref, agg_ref, hw_ref, hb_ref,
                          w1_ref, b1_ref, w2_ref, wlr_ref, bias3_ref,
                          ec_ref, pair_ref):
    """Fused: gated residual + CauseEmotionClassifier + PairsClassifier."""
    x = x_ref[0]                                                     # (N, D)
    agg = agg_ref[0]                                                 # (N, D)
    agg = jnp.where(agg > 0.0, agg, jnp.exp(jnp.minimum(agg, 0.0)) - 1.0)   # ELU
    z = jnp.dot(x, hw_ref[...], preferred_element_type=jnp.float32) + hb_ref[...]
    gate = pl.reciprocal(1.0 + jnp.exp(-z), approx=True)             # sigmoid
    out = gate * agg + (1.0 - gate) * x                              # GAT output (N, D)

    # CauseEmotionClassifier: both 2-layer stacks packed -> one (D,2*Hc) matmul
    # then one block-diagonal (2*Hc,2) matmul; lane-dense (N,2) logits.
    h1 = jnp.dot(out, w1_ref[...], preferred_element_type=jnp.float32) + b1_ref[...]
    ec = jnp.dot(h1, w2_ref[...], preferred_element_type=jnp.float32) + bias3_ref[:, 0:2]
    ec_ref[...] = ec[None]                                           # (1, N, 2)

    # PairsClassifier: dot(concat(e_i, e_j, pos, pos), w)+b == e_i.wl + e_j.wr + const;
    # the shared positional-embedding contribution is folded into bias3[:, 2].
    lr = jnp.dot(out, wlr_ref[...], preferred_element_type=jnp.float32)     # (N, 2)
    pair = lr[:, 0:1] + lr[:, 1:2].T + bias3_ref[:, 2:3]             # (N, N)
    pair_ref[...] = pair[None]


# ----------------------------- pallas_call wrappers --------------------------

def gat_core(x, adj, w_packed, a_sd, b):
    B, N, D = x.shape
    HO = w_packed.shape[1]
    H = a_sd.shape[1] // 2
    O = HO // H
    return pl.pallas_call(
        gat_core_kernel,
        grid=(B,),
        in_specs=[
            pl.BlockSpec((1, N, D), lambda i: (i, 0, 0)),
            pl.BlockSpec((1, N, N), lambda i: (i, 0, 0)),
            pl.BlockSpec((D, HO), lambda i: (0, 0)),
            pl.BlockSpec((HO, 2 * H), lambda i: (0, 0)),
            pl.BlockSpec((1, O), lambda i: (0, 0)),
        ],
        out_specs=pl.BlockSpec((H, 1, N, O), lambda i: (0, i, 0, 0)),
        out_shape=jax.ShapeDtypeStruct((H, B, N, O), jnp.float32),
        compiler_params=pltpu.CompilerParams(dimension_semantics=("parallel",)),
    )(x, adj, w_packed, a_sd, b)


def gat_gate(x, agg, hw_t, hb):
    B, N, D = x.shape
    return pl.pallas_call(
        gat_gate_kernel,
        grid=(B,),
        in_specs=[
            pl.BlockSpec((1, N, D), lambda i: (i, 0, 0)),
            pl.BlockSpec((1, N, D), lambda i: (i, 0, 0)),
            pl.BlockSpec((D, D), lambda i: (0, 0)),
            pl.BlockSpec((1, D), lambda i: (0, 0)),
        ],
        out_specs=pl.BlockSpec((1, N, D), lambda i: (i, 0, 0)),
        out_shape=jax.ShapeDtypeStruct((B, N, D), jnp.float32),
        compiler_params=pltpu.CompilerParams(dimension_semantics=("parallel",)),
    )(x, agg, hw_t, hb)


def gat_gate_heads(x, agg, hw_t, hb, w1, b1, w2, wlr, bias3):
    B, N, D = x.shape
    H2 = w1.shape[1]
    return pl.pallas_call(
        gat_gate_heads_kernel,
        grid=(B,),
        in_specs=[
            pl.BlockSpec((1, N, D), lambda i: (i, 0, 0)),
            pl.BlockSpec((1, N, D), lambda i: (i, 0, 0)),
            pl.BlockSpec((D, D), lambda i: (0, 0)),
            pl.BlockSpec((1, D), lambda i: (0, 0)),
            pl.BlockSpec((D, H2), lambda i: (0, 0)),
            pl.BlockSpec((1, H2), lambda i: (0, 0)),
            pl.BlockSpec((H2, 2), lambda i: (0, 0)),
            pl.BlockSpec((D, 2), lambda i: (0, 0)),
            pl.BlockSpec((1, 3), lambda i: (0, 0)),
        ],
        out_specs=[
            pl.BlockSpec((1, N, 2), lambda i: (i, 0, 0)),
            pl.BlockSpec((1, N, N), lambda i: (i, 0, 0)),
        ],
        out_shape=(
            jax.ShapeDtypeStruct((B, N, 2), jnp.float32),
            jax.ShapeDtypeStruct((B, N, N), jnp.float32),
        ),
        compiler_params=pltpu.CompilerParams(dimension_semantics=("parallel",)),
    )(x, agg, hw_t, hb, w1, b1, w2, wlr, bias3)


# ----------------------------- parameters ------------------------------------

def init_params(key, *, vocab=50, n_segments=2, d_model=32, n_heads=4, head_out=8,
                n_gat_layers=1, hidden_cls=384, max_seq_len=16, pos_dim=16):
    assert d_model == n_heads * head_out
    keys = iter(jax.random.split(key, 64))

    def nrm(shape, scale=0.1):
        return scale * jax.random.normal(next(keys), shape, dtype=jnp.float32)

    params = {
        "tok_emb": nrm((vocab, d_model)),
        "seg_emb": nrm((n_segments, d_model)),
        "gat_layers": [],
        "cec": {
            "ew1": nrm((d_model, hidden_cls)), "eb1": nrm((1, hidden_cls)),
            "ew2": nrm((hidden_cls, 1)), "eb2": nrm((1, 1)),
            "cw1": nrm((d_model, hidden_cls)), "cb1": nrm((1, hidden_cls)),
            "cw2": nrm((hidden_cls, 1)), "cb2": nrm((1, 1)),
        },
        "pairs": {
            "pos_emb": nrm((max_seq_len, pos_dim)),
            "wl": nrm((d_model + pos_dim, 1)),
            "wr": nrm((d_model + pos_dim, 1)),
            "b": nrm((1, 1)),
        },
    }
    for _ in range(n_gat_layers):
        params["gat_layers"].append({
            "W": nrm((n_heads, d_model, head_out)),
            "b": jnp.zeros((1, head_out), jnp.float32),        # init.zeros_
            "a_src": nrm((n_heads, head_out, 1)),
            "a_dst": nrm((n_heads, head_out, 1)),
            "Hw_t": nrm((d_model, d_model)),                   # pre-transposed Linear weight
            "Hb": nrm((1, d_model)),
        })
    return params


def pack_params(params, n_utt):
    """Fold the module's many small tensors into a few wide, kernel-ready arrays."""
    packed_layers = []
    for layer in params["gat_layers"]:
        H, D, O = layer["W"].shape
        w_packed = jnp.transpose(layer["W"], (1, 0, 2)).reshape(D, H * O)   # (D, H*O)
        a_sd = jnp.zeros((H * O, 2 * H), jnp.float32)                       # block-diag src|dst
        for h in range(H):
            a_sd = a_sd.at[h * O:(h + 1) * O, h].set(layer["a_src"][h, :, 0])
            a_sd = a_sd.at[h * O:(h + 1) * O, H + h].set(layer["a_dst"][h, :, 0])
        packed_layers.append({"w_packed": w_packed, "a_sd": a_sd, "b": layer["b"],
                              "Hw_t": layer["Hw_t"], "Hb": layer["Hb"]})

    cec = params["cec"]
    Hc = cec["ew1"].shape[1]
    w1 = jnp.concatenate([cec["ew1"], cec["cw1"]], axis=1)                  # (D, 2*Hc)
    b1 = jnp.concatenate([cec["eb1"], cec["cb1"]], axis=1)                  # (1, 2*Hc)
    w2 = jnp.zeros((2 * Hc, 2), jnp.float32)
    w2 = w2.at[:Hc, 0].set(cec["ew2"][:, 0]).at[Hc:, 1].set(cec["cw2"][:, 0])

    pp = params["pairs"]
    D = params["gat_layers"][0]["W"].shape[1]
    wl, wr = pp["wl"], pp["wr"]
    wlr = jnp.concatenate([wl[:D], wr[:D]], axis=1)                         # (D, 2)
    # couple_generator quirk: every position indexes pos_emb_layer at `seq_len`,
    # so the positional contribution to every pair logit is one scalar.
    pos_vec = pp["pos_emb"][n_utt]
    b_eff = pp["b"][0, 0] + pos_vec @ wl[D:, 0] + pos_vec @ wr[D:, 0]
    bias3 = jnp.concatenate([cec["eb2"], cec["cb2"], b_eff.reshape(1, 1)], axis=1)  # (1,3)

    return {"gat_layers": packed_layers, "w1": w1, "b1": b1, "w2": w2,
            "wlr": wlr, "bias3": bias3}


# ----------------------------- full forward ----------------------------------

def emotion_cause_pair_extractor_forward(params, packed, bert_token_b, bert_segment_b,
                                         bert_masks_b, bert_utt_b, convo_len,
                                         adj, y_mask_b):
    # TODO(synk): pretrained BertModel replaced by a deterministic synthetic
    # token+segment embedding lookup (loading a real checkpoint is out of scope).
    hidden = params["tok_emb"][bert_token_b] + params["seg_emb"][bert_segment_b]
    hidden = hidden * bert_masks_b[..., None]                        # (B, T, D)

    # batched_index_select (gather along token axis) — plain-JAX glue.
    x = jnp.take_along_axis(hidden, bert_utt_b[:, :, None], axis=1)  # (B, N, D)
    B, N, D = x.shape
    adj = adj.astype(jnp.float32)

    layers = packed["gat_layers"]
    ec = pair = None
    for li, lp in enumerate(layers):
        core = gat_core(x, adj, lp["w_packed"], lp["a_sd"], lp["b"])  # (H, B, N, O)
        H, O = core.shape[0], core.shape[3]
        # Faithful reproduction of the PyTorch quirk
        #   out_emb.transpose(0, 1).contiguous().view(batch, N, -1)
        # (which mixes head AND batch data when B > 1): core is already laid
        # out (H, B, N, O), so the quirk is a free row-major reshape here.
        agg = core.reshape(B, N, H * O)
        if li + 1 < len(layers):
            x = gat_gate(x, agg, lp["Hw_t"], lp["Hb"])
            # F.dropout(...) omitted — eval-mode identity.
        else:
            ec, pair = gat_gate_heads(x, agg, lp["Hw_t"], lp["Hb"],
                                      packed["w1"], packed["b1"], packed["w2"],
                                      packed["wlr"], packed["bias3"])

    emotion_pred = ec[..., 0]                                        # (B, N)
    cause_pred = ec[..., 1]                                          # (B, N)
    pair_pred = pair.reshape(B, N * N)                               # (B, N*N)
    return emotion_pred, cause_pred, pair_pred


# ----------------------------- main -------------------------------------------

if __name__ == "__main__":
    B, T, N = 2, 16, 8           # batch, bert tokens per convo, utterances
    D, POS = 32, 16              # input_dim_transformer, pos_emb_dim
    VOCAB = 50

    key = jax.random.PRNGKey(0)
    k_par, k_tok, k_seg, k_utt, k_adj = jax.random.split(key, 5)

    params = init_params(k_par, vocab=VOCAB, d_model=D, n_heads=4, head_out=8,
                         n_gat_layers=1, hidden_cls=384, max_seq_len=16,
                         pos_dim=POS)
    packed = pack_params(params, n_utt=N)

    bert_token_b = jax.random.randint(k_tok, (B, T), 0, VOCAB, dtype=jnp.int32)
    bert_segment_b = jax.random.randint(k_seg, (B, T), 0, 2, dtype=jnp.int32)
    bert_masks_b = jnp.ones((B, T), jnp.float32)
    bert_utt_b = jax.random.randint(k_utt, (B, N), 0, T, dtype=jnp.int32)
    convo_len = jnp.array([N, N], jnp.int32)
    # adjacency: lower-triangular (each utterance attends to itself + history);
    # guarantees every softmax row has >=1 unmasked entry (no 0/0 NaNs).
    adj = jnp.broadcast_to(jnp.tril(jnp.ones((N, N), jnp.float32)), (B, N, N))
    y_mask_b = jnp.ones((B, N), jnp.float32)

    assert int(np.max(np.asarray(convo_len))) == N  # GAT.forward assertion

    fwd = jax.jit(emotion_cause_pair_extractor_forward)
    emotion_pred, cause_pred, pair_pred = fwd(
        params, packed, bert_token_b, bert_segment_b, bert_masks_b, bert_utt_b,
        convo_len, adj, y_mask_b)

    jax.block_until_ready((emotion_pred, cause_pred, pair_pred))
    assert emotion_pred.shape == (B, N)
    assert cause_pred.shape == (B, N)
    assert pair_pred.shape == (B, N * N)
    print("KERNEL_OK")
</pallas_src>

<mosaic_0001>
module attributes {stable_mosaic.version = 11 : i64} {
  func.func @gat_core_kernel(%arg0: i32, %arg1: memref<1x8x32xf32, #tpu.memory_space<vmem>>, %arg2: memref<1x8x8xf32, #tpu.memory_space<vmem>>, %arg3: memref<32x32xf32, #tpu.memory_space<vmem>>, %arg4: memref<32x8xf32, #tpu.memory_space<vmem>>, %arg5: memref<1x8xf32, #tpu.memory_space<vmem>>, %arg6: memref<4x1x8x8xf32, #tpu.memory_space<vmem>>) attributes {dimension_semantics = [#tpu.dimension_semantics<parallel>], iteration_bounds = array<i64: 2>, scalar_prefetch = 0 : i64, scratch_operands = 0 : i64, tpu.core_type = #tpu.core_type<tc>, window_params = [{transform_indices = @transform_0, window_bounds = array<i64: 1, 8, 32>}, {transform_indices = @transform_1, window_bounds = array<i64: 1, 8, 8>}, {pipeline_mode = #tpu.pipeline_mode<synchronous>, transform_indices = @transform_2, window_bounds = array<i64: 32, 32>}, {pipeline_mode = #tpu.pipeline_mode<synchronous>, transform_indices = @transform_3, window_bounds = array<i64: 32, 8>}, {pipeline_mode = #tpu.pipeline_mode<synchronous>, transform_indices = @transform_4, window_bounds = array<i64: 1, 8>}, {transform_indices = @transform_5, window_bounds = array<i64: 4, 1, 8, 8>}]} {
    %c0 = arith.constant 0 : index
    %c0_0 = arith.constant 0 : index
    %c0_1 = arith.constant 0 : index
    %0 = vector.load %arg1[%c0, %c0_0, %c0_1] : memref<1x8x32xf32, #tpu.memory_space<vmem>>, vector<1x8x32xf32>
    %1 = vector.shape_cast %0 : vector<1x8x32xf32> to vector<8x32xf32>
    %c0_2 = arith.constant 0 : index
    %c0_3 = arith.constant 0 : index
    %c0_4 = arith.constant 0 : index
    %2 = vector.load %arg2[%c0_2, %c0_3, %c0_4] : memref<1x8x8xf32, #tpu.memory_space<vmem>>, vector<1x8x8xf32>
    %3 = vector.shape_cast %2 : vector<1x8x8xf32> to vector<8x8xf32>
    %c0_5 = arith.constant 0 : index
    %c0_6 = arith.constant 0 : index
    %4 = vector.load %arg3[%c0_5, %c0_6] : memref<32x32xf32, #tpu.memory_space<vmem>>, vector<32x32xf32>
    %cst = arith.constant dense<0.000000e+00> : vector<8x32xf32>
    %5 = tpu.matmul %1, %4, %cst {dimension_numbers = #tpu.dot_dimension_numbers<[1], [0], [0], [1], [0, 0, 1, 1], [], []>} : vector<8x32xf32>, vector<32x32xf32>, vector<8x32xf32> -> vector<8x32xf32>
    %6 = math.tanh %5 : vector<8x32xf32>
    %c0_7 = arith.constant 0 : index
    %c0_8 = arith.constant 0 : index
    %7 = vector.load %arg4[%c0_7, %c0_8] : memref<32x8xf32, #tpu.memory_space<vmem>>, vector<32x8xf32>
    %cst_9 = arith.constant dense<0.000000e+00> : vector<8x8xf32>
    %8 = tpu.matmul %6, %7, %cst_9 {dimension_numbers = #tpu.dot_dimension_numbers<[1], [0], [0], [1], [0, 0, 1, 1], [], []>} : vector<8x32xf32>, vector<32x8xf32>, vector<8x8xf32> -> vector<8x8xf32>
    %9 = vector.extract_strided_slice %8 {offsets = [0, 0], sizes = [8, 1], strides = [1, 1]} : vector<8x8xf32> to vector<8x1xf32>
    %10 = vector.extract_strided_slice %8 {offsets = [0, 4], sizes = [8, 1], strides = [1, 1]} : vector<8x8xf32> to vector<8x1xf32>
    %11 = tpu.transpose %10, [1, 0] : vector<8x1xf32> -> vector<1x8xf32>
    %12 = vector.broadcast %9 : vector<8x1xf32> to vector<8x8xf32>
    %13 = vector.broadcast %11 : vector<1x8xf32> to vector<8x8xf32>
    %14 = arith.addf %12, %13 : vector<8x8xf32>
    %cst_10 = arith.constant 0.000000e+00 : f32
    %15 = vector.broadcast %cst_10 : f32 to vector<8x8xf32>
    %16 = arith.cmpf oge, %14, %15 : vector<8x8xf32>
    %cst_11 = arith.constant 2.000000e-01 : f32
    %17 = vector.broadcast %cst_11 : f32 to vector<8x8xf32>
    %18 = arith.mulf %17, %14 : vector<8x8xf32>
    %19 = arith.select %16, %14, %18 : vector<8x8xi1>, vector<8x8xf32>
    %cst_12 = arith.constant 0.000000e+00 : f32
    %20 = vector.broadcast %cst_12 : f32 to vector<8x8xf32>
    %21 = arith.cmpf ogt, %3, %20 : vector<8x8xf32>
    %cst_13 = arith.constant -1.000000e+20 : f32
    %22 = vector.broadcast %cst_13 : f32 to vector<8x8xf32>
    %23 = arith.select %21, %19, %22 : vector<8x8xi1>, vector<8x8xf32>
    %cst_14 = arith.constant dense<0xFF800000> : vector<8xf32>
    %24 = vector.multi_reduction <maximumf>, %23, %cst_14 [1] : vector<8x8xf32> to vector<8xf32>
    %25 = vector.shape_cast %24 : vector<8xf32> to vector<8x1xf32>
    %26 = vector.broadcast %25 : vector<8x1xf32> to vector<8x8xf32>
    %27 = arith.subf %23, %26 : vector<8x8xf32>
    %28 = math.exp %27 : vector<8x8xf32>
    %cst_15 = arith.constant dense<0.000000e+00> : vector<8xf32>
    %29 = vector.multi_reduction <add>, %28, %cst_15 [1] : vector<8x8xf32> to vector<8xf32>
    %30 = vector.shape_cast %29 : vector<8xf32> to vector<8x1xf32>
    %31 = tpu.reciprocal %30 {approx = true} : vector<8x1xf32> -> vector<8x1xf32>
    %32 = vector.broadcast %31 : vector<8x1xf32> to vector<8x8xf32>
    %33 = arith.mulf %28, %32 : vector<8x8xf32>
    %34 = vector.extract_strided_slice %5 {offsets = [0, 0], sizes = [8, 8], strides = [1, 1]} : vector<8x32xf32> to vector<8x8xf32>
    %cst_16 = arith.constant dense<0.000000e+00> : vector<8x8xf32>
    %35 = tpu.matmul %33, %34, %cst_16 {dimension_numbers = #tpu.dot_dimension_numbers<[1], [0], [0], [1], [0, 0, 1, 1], [], []>} : vector<8x8xf32>, vector<8x8xf32>, vector<8x8xf32> -> vector<8x8xf32>
    %c0_17 = arith.constant 0 : index
    %c0_18 = arith.constant 0 : index
    %36 = vector.load %arg5[%c0_17, %c0_18] : memref<1x8xf32, #tpu.memory_space<vmem>>, vector<1x8xf32>
    %37 = vector.broadcast %36 : vector<1x8xf32> to vector<8x8xf32>
    %38 = arith.addf %35, %37 : vector<8x8xf32>
    %c0_19 = arith.constant 0 : index
    %c0_20 = arith.constant 0 : index
    %c0_21 = arith.constant 0 : index
    %c0_22 = arith.constant 0 : index
    %39 = vector.load %arg6[%c0_19, %c0_20, %c0_21, %c0_22] : memref<4x1x8x8xf32, #tpu.memory_space<vmem>>, vector<1x1x8x8xf32>
    %40 = vector.shape_cast %39 : vector<1x1x8x8xf32> to vector<8x8xf32>
    %41 = vector.shape_cast %38 : vector<8x8xf32> to vector<1x1x8x8xf32>
    tpu.vector_store %arg6[%c0_19, %c0_20, %c0_21, %c0_22], %41 {strides = array<i32>} : memref<4x1x8x8xf32, #tpu.memory_space<vmem>>, vector<1x1x8x8xf32>,
    %42 = vector.extract_strided_slice %8 {offsets = [0, 1], sizes = [8, 1], strides = [1, 1]} : vector<8x8xf32> to vector<8x1xf32>
    %43 = vector.extract_strided_slice %8 {offsets = [0, 5], sizes = [8, 1], strides = [1, 1]} : vector<8x8xf32> to vector<8x1xf32>
    %44 = tpu.transpose %43, [1, 0] : vector<8x1xf32> -> vector<1x8xf32>
    %45 = vector.broadcast %42 : vector<8x1xf32> to vector<8x8xf32>
    %46 = vector.broadcast %44 : vector<1x8xf32> to vector<8x8xf32>
    %47 = arith.addf %45, %46 : vector<8x8xf32>
    %cst_23 = arith.constant 0.000000e+00 : f32
    %48 = vector.broadcast %cst_23 : f32 to vector<8x8xf32>
    %49 = arith.cmpf oge, %47, %48 : vector<8x8xf32>
    %cst_24 = arith.constant 2.000000e-01 : f32
    %50 = vector.broadcast %cst_24 : f32 to vector<8x8xf32>
    %51 = arith.mulf %50, %47 : vector<8x8xf32>
    %52 = arith.select %49, %47, %51 : vector<8x8xi1>, vector<8x8xf32>
    %cst_25 = arith.constant 0.000000e+00 : f32
    %53 = vector.broadcast %cst_25 : f32 to vector<8x8xf32>
    %54 = arith.cmpf ogt, %3, %53 : vector<8x8xf32>
    %cst_26 = arith.constant -1.000000e+20 : f32
    %55 = vector.broadcast %cst_26 : f32 to vector<8x8xf32>
    %56 = arith.select %54, %52, %55 : vector<8x8xi1>, vector<8x8xf32>
    %cst_27 = arith.constant dense<0xFF800000> : vector<8xf32>
    %57 = vector.multi_reduction <maximumf>, %56, %cst_27 [1] : vector<8x8xf32> to vector<8xf32>
    %58 = vector.shape_cast %57 : vector<8xf32> to vector<8x1xf32>
    %59 = vector.broadcast %58 : vector<8x1xf32> to vector<8x8xf32>
    %60 = arith.subf %56, %59 : vector<8x8xf32>
    %61 = math.exp %60 : vector<8x8xf32>
    %cst_28 = arith.constant dense<0.000000e+00> : vector<8xf32>
    %62 = vector.multi_reduction <add>, %61, %cst_28 [1] : vector<8x8xf32> to vector<8xf32>
    %63 = vector.shape_cast %62 : vector<8xf32> to vector<8x1xf32>
    %64 = tpu.reciprocal %63 {approx = true} : vector<8x1xf32> -> vector<8x1xf32>
    %65 = vector.broadcast %64 : vector<8x1xf32> to vector<8x8xf32>
    %66 = arith.mulf %61, %65 : vector<8x8xf32>
    %67 = vector.extract_strided_slice %5 {offsets = [0, 8], sizes = [8, 8], strides = [1, 1]} : vector<8x32xf32> to vector<8x8xf32>
    %cst_29 = arith.constant dense<0.000000e+00> : vector<8x8xf32>
    %68 = tpu.matmul %66, %67, %cst_29 {dimension_numbers = #tpu.dot_dimension_numbers<[1], [0], [0], [1], [0, 0, 1, 1], [], []>} : vector<8x8xf32>, vector<8x8xf32>, vector<8x8xf32> -> vector<8x8xf32>
    %c0_30 = arith.constant 0 : index
    %c0_31 = arith.constant 0 : index
    %69 = vector.load %arg5[%c0_30, %c0_31] : memref<1x8xf32, #tpu.memory_space<vmem>>, vector<1x8xf32>
    %70 = vector.broadcast %69 : vector<1x8xf32> to vector<8x8xf32>
    %71 = arith.addf %68, %70 : vector<8x8xf32>
    %c1 = arith.constant 1 : index
    %c0_32 = arith.constant 0 : index
    %c0_33 = arith.constant 0 : index
    %c0_34 = arith.constant 0 : index
    %72 = vector.load %arg6[%c1, %c0_32, %c0_33, %c0_34] : memref<4x1x8x8xf32, #tpu.memory_space<vmem>>, vector<1x1x8x8xf32>
    %73 = vector.shape_cast %72 : vector<1x1x8x8xf32> to vector<8x8xf32>
    %74 = vector.shape_cast %71 : vector<8x8xf32> to vector<1x1x8x8xf32>
    tpu.vector_store %arg6[%c1, %c0_32, %c0_33, %c0_34], %74 {strides = array<i32>} : memref<4x1x8x8xf32, #tpu.memory_space<vmem>>, vector<1x1x8x8xf32>,
    %75 = vector.extract_strided_slice %8 {offsets = [0, 2], sizes = [8, 1], strides = [1, 1]} : vector<8x8xf32> to vector<8x1xf32>
    %76 = vector.extract_strided_slice %8 {offsets = [0, 6], sizes = [8, 1], strides = [1, 1]} : vector<8x8xf32> to vector<8x1xf32>
    %77 = tpu.transpose %76, [1, 0] : vector<8x1xf32> -> vector<1x8xf32>
    %78 = vector.broadcast %75 : vector<8x1xf32> to vector<8x8xf32>
    %79 = vector.broadcast %77 : vector<1x8xf32> to vector<8x8xf32>
    %80 = arith.addf %78, %79 : vector<8x8xf32>
    %cst_35 = arith.constant 0.000000e+00 : f32
    %81 = vector.broadcast %cst_35 : f32 to vector<8x8xf32>
    %82 = arith.cmpf oge, %80, %81 : vector<8x8xf32>
    %cst_36 = arith.constant 2.000000e-01 : f32
    %83 = vector.broadcast %cst_36 : f32 to vector<8x8xf32>
    %84 = arith.mulf %83, %80 : vector<8x8xf32>
    %85 = arith.select %82, %80, %84 : vector<8x8xi1>, vector<8x8xf32>
    %cst_37 = arith.constant 0.000000e+00 : f32
    %86 = vector.broadcast %cst_37 : f32 to vector<8x8xf32>
    %87 = arith.cmpf ogt, %3, %86 : vector<8x8xf32>
    %cst_38 = arith.constant -1.000000e+20 : f32
    %88 = vector.broadcast %cst_38 : f32 to vector<8x8xf32>
    %89 = arith.select %87, %85, %88 : vector<8x8xi1>, vector<8x8xf32>
    %cst_39 = arith.constant dense<0xFF800000> : vector<8xf32>
    %90 = vector.multi_reduction <maximumf>, %89, %cst_39 [1] : vector<8x8xf32> to vector<8xf32>
    %91 = vector.shape_cast %90 : vector<8xf32> to vector<8x1xf32>
    %92 = vector.broadcast %91 : vector<8x1xf32> to vector<8x8xf32>
    %93 = arith.subf %89, %92 : vector<8x8xf32>
    %94 = math.exp %93 : vector<8x8xf32>
    %cst_40 = arith.constant dense<0.000000e+00> : vector<8xf32>
    %95 = vector.multi_reduction <add>, %94, %cst_40 [1] : vector<8x8xf32> to vector<8xf32>
    %96 = vector.shape_cast %95 : vector<8xf32> to vector<8x1xf32>
    %97 = tpu.reciprocal %96 {approx = true} : vector<8x1xf32> -> vector<8x1xf32>
    %98 = vector.broadcast %97 : vector<8x1xf32> to vector<8x8xf32>
    %99 = arith.mulf %94, %98 : vector<8x8xf32>
    %100 = vector.extract_strided_slice %5 {offsets = [0, 16], sizes = [8, 8], strides = [1, 1]} : vector<8x32xf32> to vector<8x8xf32>
    %cst_41 = arith.constant dense<0.000000e+00> : vector<8x8xf32>
    %101 = tpu.matmul %99, %100, %cst_41 {dimension_numbers = #tpu.dot_dimension_numbers<[1], [0], [0], [1], [0, 0, 1, 1], [], []>} : vector<8x8xf32>, vector<8x8xf32>, vector<8x8xf32> -> vector<8x8xf32>
    %c0_42 = arith.constant 0 : index
    %c0_43 = arith.constant 0 : index
    %102 = vector.load %arg5[%c0_42, %c0_43] : memref<1x8xf32, #tpu.memory_space<vmem>>, vector<1x8xf32>
    %103 = vector.broadcast %102 : vector<1x8xf32> to vector<8x8xf32>
    %104 = arith.addf %101, %103 : vector<8x8xf32>
    %c2 = arith.constant 2 : index
    %c0_44 = arith.constant 0 : index
    %c0_45 = arith.constant 0 : index
    %c0_46 = arith.constant 0 : index
    %105 = vector.load %arg6[%c2, %c0_44, %c0_45, %c0_46] : memref<4x1x8x8xf32, #tpu.memory_space<vmem>>, vector<1x1x8x8xf32>
    %106 = vector.shape_cast %105 : vector<1x1x8x8xf32> to vector<8x8xf32>
    %107 = vector.shape_cast %104 : vector<8x8xf32> to vector<1x1x8x8xf32>
    tpu.vector_store %arg6[%c2, %c0_44, %c0_45, %c0_46], %107 {strides = array<i32>} : memref<4x1x8x8xf32, #tpu.memory_space<vmem>>, vector<1x1x8x8xf32>,
    %108 = vector.extract_strided_slice %8 {offsets = [0, 3], sizes = [8, 1], strides = [1, 1]} : vector<8x8xf32> to vector<8x1xf32>
    %109 = vector.extract_strided_slice %8 {offsets = [0, 7], sizes = [8, 1], strides = [1, 1]} : vector<8x8xf32> to vector<8x1xf32>
    %110 = tpu.transpose %109, [1, 0] : vector<8x1xf32> -> vector<1x8xf32>
    %111 = vector.broadcast %108 : vector<8x1xf32> to vector<8x8xf32>
    %112 = vector.broadcast %110 : vector<1x8xf32> to vector<8x8xf32>
    %113 = arith.addf %111, %112 : vector<8x8xf32>
    %cst_47 = arith.constant 0.000000e+00 : f32
    %114 = vector.broadcast %cst_47 : f32 to vector<8x8xf32>
    %115 = arith.cmpf oge, %113, %114 : vector<8x8xf32>
    %cst_48 = arith.constant 2.000000e-01 : f32
    %116 = vector.broadcast %cst_48 : f32 to vector<8x8xf32>
    %117 = arith.mulf %116, %113 : vector<8x8xf32>
    %118 = arith.select %115, %113, %117 : vector<8x8xi1>, vector<8x8xf32>
    %cst_49 = arith.constant 0.000000e+00 : f32
    %119 = vector.broadcast %cst_49 : f32 to vector<8x8xf32>
    %120 = arith.cmpf ogt, %3, %119 : vector<8x8xf32>
    %cst_50 = arith.constant -1.000000e+20 : f32
    %121 = vector.broadcast %cst_50 : f32 to vector<8x8xf32>
    %122 = arith.select %120, %118, %121 : vector<8x8xi1>, vector<8x8xf32>
    %cst_51 = arith.constant dense<0xFF800000> : vector<8xf32>
    %123 = vector.multi_reduction <maximumf>, %122, %cst_51 [1] : vector<8x8xf32> to vector<8xf32>
    %124 = vector.shape_cast %123 : vector<8xf32> to vector<8x1xf32>
    %125 = vector.broadcast %124 : vector<8x1xf32> to vector<8x8xf32>
    %126 = arith.subf %122, %125 : vector<8x8xf32>
    %127 = math.exp %126 : vector<8x8xf32>
    %cst_52 = arith.constant dense<0.000000e+00> : vector<8xf32>
    %128 = vector.multi_reduction <add>, %127, %cst_52 [1] : vector<8x8xf32> to vector<8xf32>
    %129 = vector.shape_cast %128 : vector<8xf32> to vector<8x1xf32>
    %130 = tpu.reciprocal %129 {approx = true} : vector<8x1xf32> -> vector<8x1xf32>
    %131 = vector.broadcast %130 : vector<8x1xf32> to vector<8x8xf32>
    %132 = arith.mulf %127, %131 : vector<8x8xf32>
    %133 = vector.extract_strided_slice %5 {offsets = [0, 24], sizes = [8, 8], strides = [1, 1]} : vector<8x32xf32> to vector<8x8xf32>
    %cst_53 = arith.constant dense<0.000000e+00> : vector<8x8xf32>
    %134 = tpu.matmul %132, %133, %cst_53 {dimension_numbers = #tpu.dot_dimension_numbers<[1], [0], [0], [1], [0, 0, 1, 1], [], []>} : vector<8x8xf32>, vector<8x8xf32>, vector<8x8xf32> -> vector<8x8xf32>
    %c0_54 = arith.constant 0 : index
    %c0_55 = arith.constant 0 : index
    %135 = vector.load %arg5[%c0_54, %c0_55] : memref<1x8xf32, #tpu.memory_space<vmem>>, vector<1x8xf32>
    %136 = vector.broadcast %135 : vector<1x8xf32> to vector<8x8xf32>
    %137 = arith.addf %134, %136 : vector<8x8xf32>
    %c3 = arith.constant 3 : index
    %c0_56 = arith.constant 0 : index
    %c0_57 = arith.constant 0 : index
    %c0_58 = arith.constant 0 : index
    %138 = vector.load %arg6[%c3, %c0_56, %c0_57, %c0_58] : memref<4x1x8x8xf32, #tpu.memory_space<vmem>>, vector<1x1x8x8xf32>
    %139 = vector.shape_cast %138 : vector<1x1x8x8xf32> to vector<8x8xf32>
    %140 = vector.shape_cast %137 : vector<8x8xf32> to vector<1x1x8x8xf32>
    tpu.vector_store %arg6[%c3, %c0_56, %c0_57, %c0_58], %140 {strides = array<i32>} : memref<4x1x8x8xf32, #tpu.memory_space<vmem>>, vector<1x1x8x8xf32>,
    return
  }
  func.func @transform_0(%arg0: i32) -> (i32, i32, i32) {
    %c0_i32 = arith.constant 0 : i32
    %c0_i32_0 = arith.constant 0 : i32
    %c0_i32_1 = arith.constant 0 : i32
    return %arg0, %c0_i32, %c0_i32_0 : i32, i32, i32
  }
  func.func @transform_1(%arg0: i32) -> (i32, i32, i32) {
    %c0_i32 = arith.constant 0 : i32
    %c0_i32_0 = arith.constant 0 : i32
    %c0_i32_1 = arith.constant 0 : i32
    return %arg0, %c0_i32, %c0_i32_0 : i32, i32, i32
  }
  func.func @transform_2(%arg0: i32) -> (i32, i32) {
    %c0_i32 = arith.constant 0 : i32
    %c0_i32_0 = arith.constant 0 : i32
    %c0_i32_1 = arith.constant 0 : i32
    return %c0_i32, %c0_i32_0 : i32, i32
  }
  func.func @transform_3(%arg0: i32) -> (i32, i32) {
    %c0_i32 = arith.constant 0 : i32
    %c0_i32_0 = arith.constant 0 : i32
    %c0_i32_1 = arith.constant 0 : i32
    return %c0_i32, %c0_i32_0 : i32, i32
  }
  func.func @transform_4(%arg0: i32) -> (i32, i32) {
    %c0_i32 = arith.constant 0 : i32
    %c0_i32_0 = arith.constant 0 : i32
    %c0_i32_1 = arith.constant 0 : i32
    return %c0_i32, %c0_i32_0 : i32, i32
  }
  func.func @transform_5(%arg0: i32) -> (i32, i32, i32, i32) {
    %c0_i32 = arith.constant 0 : i32
    %c0_i32_0 = arith.constant 0 : i32
    %c0_i32_1 = arith.constant 0 : i32
    %c0_i32_2 = arith.constant 0 : i32
    return %c0_i32, %arg0, %c0_i32_0, %c0_i32_1 : i32, i32, i32, i32
  }
}

module attributes {stable_mosaic.version = 11 : i64} {
  func.func @gat_gate_heads_kernel(%arg0: i32, %arg1: memref<1x8x32xf32, #tpu.memory_space<vmem>>, %arg2: memref<1x8x32xf32, #tpu.memory_space<vmem>>, %arg3: memref<32x32xf32, #tpu.memory_space<vmem>>, %arg4: memref<1x32xf32, #tpu.memory_space<vmem>>, %arg5: memref<32x768xf32, #tpu.memory_space<vmem>>, %arg6: memref<1x768xf32, #tpu.memory_space<vmem>>, %arg7: memref<768x2xf32, #tpu.memory_space<vmem>>, %arg8: memref<32x2xf32, #tpu.memory_space<vmem>>, %arg9: memref<1x3xf32, #tpu.memory_space<vmem>>, %arg10: memref<1x8x2xf32, #tpu.memory_space<vmem>>, %arg11: memref<1x8x8xf32, #tpu.memory_space<vmem>>) attributes {dimension_semantics = [#tpu.dimension_semantics<parallel>], iteration_bounds = array<i64: 2>, scalar_prefetch = 0 : i64, scratch_operands = 0 : i64, tpu.core_type = #tpu.core_type<tc>, window_params = [{transform_indices = @transform_0, window_bounds = array<i64: 1, 8, 32>}, {transform_indices = @transform_1, window_bounds = array<i64: 1, 8, 32>}, {pipeline_mode = #tpu.pipeline_mode<synchronous>, transform_indices = @transform_2, window_bounds = array<i64: 32, 32>}, {pipeline_mode = #tpu.pipeline_mode<synchronous>, transform_indices = @transform_3, window_bounds = array<i64: 1, 32>}, {pipeline_mode = #tpu.pipeline_mode<synchronous>, transform_indices = @transform_4, window_bounds = array<i64: 32, 768>}, {pipeline_mode = #tpu.pipeline_mode<synchronous>, transform_indices = @transform_5, window_bounds = array<i64: 1, 768>}, {pipeline_mode = #tpu.pipeline_mode<synchronous>, transform_indices = @transform_6, window_bounds = array<i64: 768, 2>}, {pipeline_mode = #tpu.pipeline_mode<synchronous>, transform_indices = @transform_7, window_bounds = array<i64: 32, 2>}, {pipeline_mode = #tpu.pipeline_mode<synchronous>, transform_indices = @transform_8, window_bounds = array<i64: 1, 3>}, {transform_indices = @transform_9, window_bounds = array<i64: 1, 8, 2>}, {transform_indices = @transform_10, window_bounds = array<i64: 1, 8, 8>}]} {
    %c0 = arith.constant 0 : index
    %c0_0 = arith.constant 0 : index
    %c0_1 = arith.constant 0 : index
    %0 = vector.load %arg1[%c0, %c0_0, %c0_1] : memref<1x8x32xf32, #tpu.memory_space<vmem>>, vector<1x8x32xf32>
    %1 = vector.shape_cast %0 : vector<1x8x32xf32> to vector<8x32xf32>
    %c0_2 = arith.constant 0 : index
    %c0_3 = arith.constant 0 : index
    %c0_4 = arith.constant 0 : index
    %2 = vector.load %arg2[%c0_2, %c0_3, %c0_4] : memref<1x8x32xf32, #tpu.memory_space<vmem>>, vector<1x8x32xf32>
    %3 = vector.shape_cast %2 : vector<1x8x32xf32> to vector<8x32xf32>
    %cst = arith.constant 0.000000e+00 : f32
    %4 = vector.broadcast %cst : f32 to vector<8x32xf32>
    %5 = arith.cmpf ogt, %3, %4 : vector<8x32xf32>
    %cst_5 = arith.constant 0.000000e+00 : f32
    %6 = vector.broadcast %cst_5 : f32 to vector<8x32xf32>
    %7 = arith.minimumf %3, %6 : vector<8x32xf32>
    %8 = math.exp %7 : vector<8x32xf32>
    %cst_6 = arith.constant 1.000000e+00 : f32
    %9 = vector.broadcast %cst_6 : f32 to vector<8x32xf32>
    %10 = arith.subf %8, %9 : vector<8x32xf32>
    %11 = arith.select %5, %3, %10 : vector<8x32xi1>, vector<8x32xf32>
    %c0_7 = arith.constant 0 : index
    %c0_8 = arith.constant 0 : index
    %12 = vector.load %arg3[%c0_7, %c0_8] : memref<32x32xf32, #tpu.memory_space<vmem>>, vector<32x32xf32>
    %cst_9 = arith.constant dense<0.000000e+00> : vector<8x32xf32>
    %13 = tpu.matmul %1, %12, %cst_9 {dimension_numbers = #tpu.dot_dimension_numbers<[1], [0], [0], [1], [0, 0, 1, 1], [], []>} : vector<8x32xf32>, vector<32x32xf32>, vector<8x32xf32> -> vector<8x32xf32>
    %c0_10 = arith.constant 0 : index
    %c0_11 = arith.constant 0 : index
    %14 = vector.load %arg4[%c0_10, %c0_11] : memref<1x32xf32, #tpu.memory_space<vmem>>, vector<1x32xf32>
    %15 = vector.broadcast %14 : vector<1x32xf32> to vector<8x32xf32>
    %16 = arith.addf %13, %15 : vector<8x32xf32>
    %cst_12 = arith.constant 0.000000e+00 : f32
    %17 = vector.broadcast %cst_12 : f32 to vector<8x32xf32>
    %18 = arith.subf %17, %16 : vector<8x32xf32>
    %19 = math.exp %18 : vector<8x32xf32>
    %cst_13 = arith.constant 1.000000e+00 : f32
    %20 = vector.broadcast %cst_13 : f32 to vector<8x32xf32>
    %21 = arith.addf %20, %19 : vector<8x32xf32>
    %22 = tpu.reciprocal %21 {approx = true} : vector<8x32xf32> -> vector<8x32xf32>
    %23 = arith.mulf %22, %11 : vector<8x32xf32>
    %cst_14 = arith.constant 1.000000e+00 : f32
    %24 = vector.broadcast %cst_14 : f32 to vector<8x32xf32>
    %25 = arith.subf %24, %22 : vector<8x32xf32>
    %26 = arith.mulf %25, %1 : vector<8x32xf32>
    %27 = arith.addf %23, %26 : vector<8x32xf32>
    %c0_15 = arith.constant 0 : index
    %c0_16 = arith.constant 0 : index
    %28 = vector.load %arg5[%c0_15, %c0_16] : memref<32x768xf32, #tpu.memory_space<vmem>>, vector<32x768xf32>
    %cst_17 = arith.constant dense<0.000000e+00> : vector<8x768xf32>
    %29 = tpu.matmul %27, %28, %cst_17 {dimension_numbers = #tpu.dot_dimension_numbers<[1], [0], [0], [1], [0, 0, 1, 1], [], []>} : vector<8x32xf32>, vector<32x768xf32>, vector<8x768xf32> -> vector<8x768xf32>
    %c0_18 = arith.constant 0 : index
    %c0_19 = arith.constant 0 : index
    %30 = vector.load %arg6[%c0_18, %c0_19] : memref<1x768xf32, #tpu.memory_space<vmem>>, vector<1x768xf32>
    %31 = vector.broadcast %30 : vector<1x768xf32> to vector<8x768xf32>
    %32 = arith.addf %29, %31 : vector<8x768xf32>
    %c0_20 = arith.constant 0 : index
    %c0_21 = arith.constant 0 : index
    %33 = vector.load %arg7[%c0_20, %c0_21] : memref<768x2xf32, #tpu.memory_space<vmem>>, vector<768x2xf32>
    %cst_22 = arith.constant dense<0.000000e+00> : vector<8x2xf32>
    %34 = tpu.matmul %32, %33, %cst_22 {dimension_numbers = #tpu.dot_dimension_numbers<[1], [0], [0], [1], [0, 0, 1, 1], [], []>} : vector<8x768xf32>, vector<768x2xf32>, vector<8x2xf32> -> vector<8x2xf32>
    %c0_23 = arith.constant 0 : index
    %c0_24 = arith.constant 0 : index
    %35 = vector.load %arg9[%c0_23, %c0_24] : memref<1x3xf32, #tpu.memory_space<vmem>>, vector<1x2xf32>
    %36 = vector.broadcast %35 : vector<1x2xf32> to vector<8x2xf32>
    %37 = arith.addf %34, %36 : vector<8x2xf32>
    %38 = vector.shape_cast %37 : vector<8x2xf32> to vector<1x8x2xf32>
    %c0_25 = arith.constant 0 : index
    %c0_26 = arith.constant 0 : index
    %c0_27 = arith.constant 0 : index
    %39 = vector.load %arg10[%c0_25, %c0_26, %c0_27] : memref<1x8x2xf32, #tpu.memory_space<vmem>>, vector<1x8x2xf32>
    tpu.vector_store %arg10[%c0_25, %c0_26, %c0_27], %38 {strides = array<i32>} : memref<1x8x2xf32, #tpu.memory_space<vmem>>, vector<1x8x2xf32>,
    %c0_28 = arith.constant 0 : index
    %c0_29 = arith.constant 0 : index
    %40 = vector.load %arg8[%c0_28, %c0_29] : memref<32x2xf32, #tpu.memory_space<vmem>>, vector<32x2xf32>
    %cst_30 = arith.constant dense<0.000000e+00> : vector<8x2xf32>
    %41 = tpu.matmul %27, %40, %cst_30 {dimension_numbers = #tpu.dot_dimension_numbers<[1], [0], [0], [1], [0, 0, 1, 1], [], []>} : vector<8x32xf32>, vector<32x2xf32>, vector<8x2xf32> -> vector<8x2xf32>
    %42 = vector.extract_strided_slice %41 {offsets = [0, 0], sizes = [8, 1], strides = [1, 1]} : vector<8x2xf32> to vector<8x1xf32>
    %43 = vector.extract_strided_slice %41 {offsets = [0, 1], sizes = [8, 1], strides = [1, 1]} : vector<8x2xf32> to vector<8x1xf32>
    %44 = tpu.transpose %43, [1, 0] : vector<8x1xf32> -> vector<1x8xf32>
    %45 = vector.broadcast %42 : vector<8x1xf32> to vector<8x8xf32>
    %46 = vector.broadcast %44 : vector<1x8xf32> to vector<8x8xf32>
    %47 = arith.addf %45, %46 : vector<8x8xf32>
    %c0_31 = arith.constant 0 : index
    %c2 = arith.constant 2 : index
    %48 = vector.load %arg9[%c0_31, %c2] : memref<1x3xf32, #tpu.memory_space<vmem>>, vector<1x1xf32>
    %49 = vector.broadcast %48 : vector<1x1xf32> to vector<8x8xf32>
    %50 = arith.addf %47, %49 : vector<8x8xf32>
    %51 = vector.shape_cast %50 : vector<8x8xf32> to vector<1x8x8xf32>
    %c0_32 = arith.constant 0 : index
    %c0_33 = arith.constant 0 : index
    %c0_34 = arith.constant 0 : index
    %52 = vector.load %arg11[%c0_32, %c0_33, %c0_34] : memref<1x8x8xf32, #tpu.memory_space<vmem>>, vector<1x8x8xf32>
    tpu.vector_store %arg11[%c0_32, %c0_33, %c0_34], %51 {strides = array<i32>} : memref<1x8x8xf32, #tpu.memory_space<vmem>>, vector<1x8x8xf32>,
    return
  }
  func.func @transform_0(%arg0: i32) -> (i32, i32, i32) {
    %c0_i32 = arith.constant 0 : i32
    %c0_i32_0 = arith.constant 0 : i32
    %c0_i32_1 = arith.constant 0 : i32
    return %arg0, %c0_i32, %c0_i32_0 : i32, i32, i32
  }
  func.func @transform_1(%arg0: i32) -> (i32, i32, i32) {
    %c0_i32 = arith.constant 0 : i32
    %c0_i32_0 = arith.constant 0 : i32
    %c0_i32_1 = arith.constant 0 : i32
    return %arg0, %c0_i32, %c0_i32_0 : i32, i32, i32
  }
  func.func @transform_2(%arg0: i32) -> (i32, i32) {
    %c0_i32 = arith.constant 0 : i32
    %c0_i32_0 = arith.constant 0 : i32
    %c0_i32_1 = arith.constant 0 : i32
    return %c0_i32, %c0_i32_0 : i32, i32
  }
  func.func @transform_3(%arg0: i32) -> (i32, i32) {
    %c0_i32 = arith.constant 0 : i32
    %c0_i32_0 = arith.constant 0 : i32
    %c0_i32_1 = arith.constant 0 : i32
    return %c0_i32, %c0_i32_0 : i32, i32
  }
  func.func @transform_4(%arg0: i32) -> (i32, i32) {
    %c0_i32 = arith.constant 0 : i32
    %c0_i32_0 = arith.constant 0 : i32
    %c0_i32_1 = arith.constant 0 : i32
    return %c0_i32, %c0_i32_0 : i32, i32
  }
  func.func @transform_5(%arg0: i32) -> (i32, i32) {
    %c0_i32 = arith.constant 0 : i32
    %c0_i32_0 = arith.constant 0 : i32
    %c0_i32_1 = arith.constant 0 : i32
    return %c0_i32, %c0_i32_0 : i32, i32
  }
  func.func @transform_6(%arg0: i32) -> (i32, i32) {
    %c0_i32 = arith.constant 0 : i32
    %c0_i32_0 = arith.constant 0 : i32
    %c0_i32_1 = arith.constant 0 : i32
    return %c0_i32, %c0_i32_0 : i32, i32
  }
  func.func @transform_7(%arg0: i32) -> (i32, i32) {
    %c0_i32 = arith.constant 0 : i32
    %c0_i32_0 = arith.constant 0 : i32
    %c0_i32_1 = arith.constant 0 : i32
    return %c0_i32, %c0_i32_0 : i32, i32
  }
  func.func @transform_8(%arg0: i32) -> (i32, i32) {
    %c0_i32 = arith.constant 0 : i32
    %c0_i32_0 = arith.constant 0 : i32
    %c0_i32_1 = arith.constant 0 : i32
    return %c0_i32, %c0_i32_0 : i32, i32
  }
  func.func @transform_9(%arg0: i32) -> (i32, i32, i32) {
    %c0_i32 = arith.constant 0 : i32
    %c0_i32_0 = arith.constant 0 : i32
    %c0_i32_1 = arith.constant 0 : i32
    return %arg0, %c0_i32, %c0_i32_0 : i32, i32, i32
  }
  func.func @transform_10(%arg0: i32) -> (i32, i32, i32) {
    %c0_i32 = arith.constant 0 : i32
    %c0_i32_0 = arith.constant 0 : i32
    %c0_i32_1 = arith.constant 0 : i32
    return %arg0, %c0_i32, %c0_i32_0 : i32, i32, i32
  }
}

</mosaic_0001>

<bundles_post_ra>
// kernel: emotion_cause_pair_extractor_forward.2
= control target key start
LH: loop header
LB: loop body
LE: loop exit
PB: predicated region body
PF: predicated region fallthrough
CT: control target
= control target key end

     0   :  { %s1307_s18 = smov 0   ;;  %s1309_s19 = smov 0   ;;  %s1440_s0 = inlined_call_operand.vmem [shape: f32[2,8,32], index: 0, kind: input, shape index: {}]   ;;  %s1441_s1 = inlined_call_operand.vmem [shape: f32[2,8,8], index: 1, kind: input, shape index: {}]   ;;  %s1442_s2 = inlined_call_operand.vmem [shape: f32[32,32], index: 2, kind: input, shape index: {}]   ;;  %s1443_s3 = inlined_call_operand.vmem [shape: f32[32,8], index: 3, kind: input, shape index: {}]   ;;  %s1444_s4 = inlined_call_operand.vmem [shape: f32[1,8], index: 4, kind: input, shape index: {}]   ;;  %s1445_s5 = inlined_call_operand.vmem [shape: f32[4,2,8,8], index: 5, kind: output, shape index: {}]  }
   0x1   :  { %s1311_s20 = smov 0  }
   0x2 LB: > { %s1320_s21 = sadd.s32 4294967295, %s1261_s20   ;;  %s1322_s22 = sadd.s32 1, %s1261_s20   ;;  %s1261_s20 = sphi %s1311_s20, %s1449_s20   ;;  %s1257_s19 = sphi %s1309_s19, %s1448_s19   ;;  %s1253_s18 = sphi %s1307_s18, %s1447_s18  }
   0x3   : > { %s134_s23 = ssub.s32 %s1261_s20, %s1322_s22  ;;  %s137_s24 = sadd.s32 1, %s1257_s19 }
   0x4   : > { %p135_p0 = scmp.eq.s32.totalorder %s134_s23, 0  ;;  %p147_p1 = scmp.ne.s32.totalorder %s1257_s19, %s1253_s18 }
   0x5   : > { %p148_p2 = scmp.eq.s32.totalorder %s1320_s21, 1  ;;  %p1086_p3 = scmp.ge.s32.totalorder %s1261_s20, 1 }
   0x6   : > { %s1330_s25 = scalar_select %p135_p0, %s1257_s19, %s137_s24  }
   0x7   : > { %p1332_p4 = por %p148_p2, %p147_p1  ;;  %p195_p5 = scmp.lt.s32.totalorder %s1261_s20, 3 }
   0x9   : > { %p196_p6 = pnand %p1086_p3, %p195_p5 }
   0xa   : > { %v235_v0 = vld [vmem:[%s1442_s2] sm:$0xff] (!%p196_p6)  ;;  %v236_v1 = vld [vmem:[%s1442_s2 + $0x8] sm:$0xff] (!%p196_p6)  ;;  %v237_v2 = vld [vmem:[%s1442_s2 + $0x10] sm:$0xff] (!%p196_p6)  ;;  %v1263_v3 = vmov (!%p196_p6), 0.0|0.0   ;;  %vm1264_vm0 = vmmov (!%p196_p6), 0   ;;  %v1265_v6 = vmov (!%p196_p6), 0.0   ;;  %v431_v28 = vlaneseq (!%p196_p6) }
   0xb   : > { %199 = sbr.rel (%p196_p6) target bundleno = 1257 (0x4e9), region = 40  ;;  %1167 = vmatprep.subr.bf16.mxu0 (!%p196_p6), %v1263_v3  ;;  %v1168_v4 = vpack.c.bf16 (!%p196_p6), %v236_v1, %v235_v0  ;;  %v238_v5 = vld [vmem:[%s1442_s2 + $0x18] sm:$0xff] (!%p196_p6)  ;;  %1133 = vmatprep.mubr.msk.f32.mxu0 (!%p196_p6), %vm1264_vm0, %v1265_v6  ;;  %p225_p7 = scmp.lt.s32.totalorder (!%p196_p6), %s1320_s21, 1  ;;  %vm239_vm1 = vcmask (!%p196_p6), 261120   ;;  %v314_v9 = vld [vmem:[%s1443_s3] sm:$0xff] (!%p196_p6)  ;;  %v315_v10 = vld [vmem:[%s1443_s3 + $0x8] sm:$0xff] (!%p196_p6) }
   0xc   : > { %1173 = vmatprep.subr.bf16.mxu1 (!%p196_p6), %v1263_v3  ;;  %1144 = vmatprep.mubr.msk.f32.mxu1 (!%p196_p6), %vm1264_vm0, %v1265_v6  ;;  %v1171_v7 = vpack.c.bf16 (!%p196_p6), %v238_v5, %v237_v2  ;;  %v316_v11 = vld [vmem:[%s1443_s3 + $0x10] sm:$0xff] (!%p196_p6)  ;;  %v1174_v12 = vpack.c.bf16 (!%p196_p6), %v315_v10, %v314_v9  ;;  %v317_v13 = vld [vmem:[%s1443_s3 + $0x18] sm:$0xff] (!%p196_p6)  ;;  %v1266_v18 = vmov (!%p196_p6), 1   ;;  %v1267_v19 = vmov (!%p196_p6), 0   ;;  %s1268_s29 = smov (!%p196_p6), 122   ;;  %s1269_s30 = smov (!%p196_p6), 124  }
   0xd   : > { %1169 = vmatpush3.bf16.msra.mxu0 (!%p196_p6), %v1168_v4  ;;  %v1177_v14 = vpack.c.bf16 (!%p196_p6), %v317_v13, %v316_v11  ;;  %1218 = vset.pattern.permute.xlu1 (!%p196_p6), %v1266_v18  ;;  %s1270_s6 = smov (!%p196_p6), 121   ;;  %s1271_s7 = smov (!%p196_p6), 123   ;;  %v1272_v22 = vmov (!%p196_p6), 2   ;;  %v1273_v23 = vmov (!%p196_p6), 3   ;;  %v432_v30 = vshrl.u32 (!%p196_p6), %v431_v28, 7 }
   0xe   : > { %1170 = vmatprep.subr.bf16.mxu0 (!%p196_p6), %v1263_v3  ;;  %1175 = vmatpush3.bf16.msra.mxu1 (!%p196_p6), %v1174_v12  ;;  %vm441_vm4 = vcmask (!%p196_p6), 64512   ;;  %s1276_s13 = smov (!%p196_p6), 112  }
   0xf   : > { %1176 = vmatprep.subr.bf16.mxu1 (!%p196_p6), %v1263_v3  ;;  %1217 = vset.pattern.permute.xlu0 (!%p196_p6), %v1267_v19  ;;  %v433_v33 = vsub.s32 (!%p196_p6), 0, %v432_v30 }
  0x11   : > { %1172 = vmatpush3.bf16.msra.mxu0 (!%p196_p6), %v1171_v7 }
  0x12   : > { %s1354_s10 = scalar_select %p225_p7, %s1320_s21, 1  ;;  %1147 = vmatprep.subr.mxu0 %v1265_v6  ;;  %1178 = vmatpush3.bf16.msra.mxu1 %v1177_v14 }
  0x13   : > { %1152 = vmatprep.subr.mxu1 %v1265_v6 }
  0x14   : > { %s1088_s11 = sshll.u32 %s1354_s10, 3  ;;  %s1274_s10 = smov 120  }
  0x15   : > { %s228_s14 = scalar_lea.vmem %s1440_s0, %s1088_s11  ;;  %s232_s12 = scalar_lea.vmem %s1441_s1, %s1088_s11 }
  0x16   : > { %v233_v8 = vld [vmem:[%s228_s14] sm:$0xff]  ;;  %s1275_s11 = smov 104   ;;  %s222_s14 = sand.u32 1, %s1253_s18  }
  0x17   : > { %1134 = vmatmul.mubr.msk.f32.vlgmr.msra.gmra.mrb[0].mxu0 %vm239_vm1, %v233_v8  ;;  %v234_v37 = vld [vmem:[%s232_s12] sm:$0xff]  ;;  %s1087_s15 = sshll.u32 %s222_s14, 5  ;;  %s1104_s18 = sshll.u32 (%p1332_p4), %s1320_s21, 3 }
  0x18   : > { %1149 = vmatprep.mubr.msk.f32.mxu0 %vm1264_vm0, %v1265_v6  ;;  %vm439_vm2 = vcmp.gt.f32.partialorder %v234_v37, 0.0  ;;  %s224_s20 = scalar_lea.vmem [#allocation2], %s1087_s15  ;;  %s975_s27 = scalar_lea.vmem (%p1332_p4), %s1445_s5, %s1104_s18 }
  0xea   : > { %v1379_v15 = vpop.f32.mrb[0].mxu0 }
  0xeb   : > { %1221 = vtanh.f32 %v1379_v15  ;;  %v1135_v16 = vpop.f32.mrb[1].mxu0  ;;  %1148 = vmatpush3.msra.mxu0 %v1379_v15 }
  0xec   : > { %1157 = vmatprep.subr.mxu0 %v1265_v6 }
  0xf5   : > { %v1222_v17 = vpop.eup %1221 }
  0xf6   : > { %1145 = vmatmul.mubr.msk.f32.vlgmr.msra.gmra.mrb[0].mxu1 %vm239_vm1, %v1222_v17 }
  0xf7   : > { %1154 = vmatprep.mubr.msk.f32.mxu1 %vm1264_vm0, %v1265_v6 }
 0x1c9   : > { %v387_v20 = vpop.f32.mrb[0].mxu1 }
 0x1ca   : > { %679 = vrot.lane.b32.xlu1 %v387_v20, %s1268_s29  ;;  %392 = vrot.lane.b32.xlu0 %v387_v20, %s1269_s30  ;;  %v1146_v21 = vpop.f32.mrb[1].mxu1 }
 0x1ce   : > { %823 = vrot.lane.b32.xlu1 %v387_v20, %s1270_s6  ;;  %534 = vrot.lane.b32.xlu0 %v387_v20, %s1271_s7 }
 0x1d2   : > { %570 = vperm.xlu1 %1218, %v387_v20   ;;  %428 = vperm.xlu0 %1217, %v387_v20  }
 0x1d6   : > { %1219 = vset.pattern.permute.xlu1 %v1272_v22  ;;  %1220 = vset.pattern.permute.xlu0 %v1273_v23 }
 0x1d7   : > { %715 = vperm.xlu1 %1219, %v387_v20   ;;  %859 = vperm.xlu0 %1220, %v387_v20  }
 0x23c   : > { %v680_v24 = vpop.permute.xlu1 %679  ;;  %v393_v25 = vpop.permute.xlu0 %392 }
 0x23d   : > { %395 = vxpose.xlu1.b32.start.end [1/1] (short) (narrow) %v393_v25, 8 }
 0x240   : > { %v824_v26 = vpop.permute.xlu1 %823  ;;  %v535_v27 = vpop.permute.xlu0 %534 }
 0x241   : > { %826 = vxpose.xlu1.b32.start.end [1/1] (short) (narrow) %v824_v26, 8  ;;  %537 = vxpose.xlu0.b32.start.end [1/1] (short) (narrow) %v535_v27, 8 }
 0x245   : > { %682 = vxpose.xlu0.b32.start.end [1/1] (short) (narrow) %v680_v24, 8 }
 0x251   : > { %v571_v29 = vpop.permute.xlu1 %570  ;;  %v429_v31 = vpop.permute.xlu0 %428 }
 0x256   : > { %v716_v32 = vpop.permute.xlu1 %715  ;;  %v860_v34 = vpop.permute.xlu0 %859 }
 0x2bd   : > { %v411_v35 = vpop.trf.xlu1 }
 0x2be   : > { %v434_v36 = vrot.slane %v411_v35, %v433_v33 }
 0x2c0   : > { %v435_v38 = vadd.f32 %v434_v36, %v429_v31  ;;  %v1092_v36 = vld [vmem:[%s1444_s4] ss:$0 sm:$0xff] }
 0x2c1   : > { %v842_v39 = vpop.trf.xlu1  ;;  %v553_v40 = vpop.trf.xlu0 }
 0x2c2   : > { %v865_v41 = vrot.slane %v842_v39, %v433_v33  ;;  %v576_v42 = vrot.slane %v553_v40, %v433_v33  ;;  %vm436_vm3 = vcmp.ge.f32.partialorder %v435_v38, 0.0  ;;  %v437_v43 = vmul.f32 0.2, %v435_v38 }
 0x2c4   : > { %v866_v44 = vadd.f32 %v865_v41, %v860_v34  ;;  %v577_v45 = vadd.f32 %v576_v42, %v571_v29  ;;  %v438_v46 = vsel %vm436_vm3, %v435_v38, %v437_v43 }
 0x2c5   : > { %v698_v47 = vpop.trf.xlu0  ;;  %v440_v48 = vsel %vm439_vm2, %v438_v46, -1e+20 }
 0x2c6   : > { %v721_v49 = vrot.slane %v698_v47, %v433_v33  ;;  %v442_v50 = vsel %vm441_vm4, %v440_v48, -inf  ;;  %vm867_vm5 = vcmp.ge.f32.partialorder %v866_v44, 0.0  ;;  %v868_v51 = vmul.f32 0.2, %v866_v44 }
 0x2c7   : > { %443 = vmax.xlane.f32.xlu0 %v442_v50  ;;  %vm578_vm6 = vcmp.ge.f32.partialorder %v577_v45, 0.0  ;;  %v579_v52 = vmul.f32 0.2, %v577_v45 }
 0x2c8   : > { %v722_v53 = vadd.f32 %v721_v49, %v716_v32  ;;  %v869_v54 = vsel %vm867_vm5, %v866_v44, %v868_v51 }
 0x2c9   : > { %v870_v55 = vsel %vm439_vm2, %v869_v54, -1e+20  ;;  %v580_v56 = vsel %vm578_vm6, %v577_v45, %v579_v52 }
 0x2ca   : > { %v871_v57 = vsel %vm441_vm4, %v870_v55, -inf  ;;  %v581_v58 = vsel %vm439_vm2, %v580_v56, -1e+20  ;;  %vm723_vm7 = vcmp.ge.f32.partialorder %v722_v53, 0.0  ;;  %v724_v59 = vmul.f32 0.2, %v722_v53 }
 0x2cb   : > { %872 = vmax.xlane.f32.xlu0 %v871_v57  ;;  %v582_v60 = vsel %vm441_vm4, %v581_v58, -inf }
 0x2cc   : > { %583 = vmax.xlane.f32.xlu1 %v582_v60  ;;  %v725_v61 = vsel %vm723_vm7, %v722_v53, %v724_v59 }
 0x2cd   : > { %v726_v62 = vsel %vm439_vm2, %v725_v61, -1e+20 }
 0x2ce   : > { %v727_v63 = vsel %vm441_vm4, %v726_v62, -inf }
 0x2d0   : > { %728 = vmax.xlane.f32.xlu1 %v727_v63 }
 0x2e1   : > { %601 = vrot.lane.b32.xlu1 %v1379_v15, %s1274_s10 }
 0x354   : > { %v444_v0 = vpop.xlane.xlu0 %443 }
 0x355   : > { %v445_v1 = vsub.f32 %v440_v48, %v444_v0 }
 0x357   : > { %v446_v2 = vmul.f32 1.442695, %v445_v1 }
 0x358   : > { %v873_v3 = vpop.xlane.xlu0 %872 }
 0x359   : > { %1223 = vpow2.f32 %v446_v2  ;;  %v584_v4 = vpop.xlane.xlu1 %583  ;;  %v874_v5 = vsub.f32 %v870_v55, %v873_v3 }
 0x35a   : > { %v585_v7 = vsub.f32 %v581_v58, %v584_v4 }
 0x35b   : > { %v875_v9 = vmul.f32 1.442695, %v874_v5 }
 0x35c   : > { %v586_v8 = vmul.f32 1.442695, %v585_v7 }
 0x35d   : > { %v729_v10 = vpop.xlane.xlu1 %728 }
 0x35e   : > { %1225 = vpow2.f32 %v586_v8  ;;  %v730_v11 = vsub.f32 %v726_v62, %v729_v10 }
 0x35f   : > { %1227 = vpow2.f32 %v875_v9 }
 0x360   : > { %v731_v12 = vmul.f32 1.442695, %v730_v11 }
 0x361   : > { %v602_v13 = vpop.permute.xlu1 %601 }
 0x362   : > { %1229 = vpow2.f32 %v731_v12  ;;  %1153 = vmatpush3.msra.mxu1 %v602_v13 }
 0x363   : > { %v1224_v14 = vpop.eup %1223  ;;  %1162 = vmatprep.subr.mxu1 %v1265_v6 }
 0x364   : > { %v448_v16 = vsel %vm441_vm4, %v1224_v14, 0.0 }
 0x365   : > { %449 = vadd.xlane.f32.xlu1 %v448_v16 }
 0x368   : > { %v1226_v17 = vpop.eup %1225 }
 0x369   : > { %v588_v18 = vsel %vm441_vm4, %v1226_v17, 0.0  ;;  %v1228_v19 = vpop.eup %1227 }
 0x36a   : > { %589 = vadd.xlane.f32.xlu0 %v588_v18  ;;  %v877_v22 = vsel %vm441_vm4, %v1228_v19, 0.0 }
 0x36c   : > { %v1230_v20 = vpop.eup %1229 }
 0x36d   : > { %v733_v21 = vsel %vm441_vm4, %v1230_v20, 0.0 }
 0x36e   : > { %734 = vadd.xlane.f32.xlu1 %v733_v21  ;;  %878 = vadd.xlane.f32.xlu0 %v877_v22 }
 0x37f   : > { %889 = vrot.lane.b32.xlu1 %v1379_v15, %s1275_s11 }
 0x384   : > { %745 = vrot.lane.b32.xlu0 %v1379_v15, %s1276_s13 }
 0x3f2   : > { %v450_v23 = vpop.xlane.xlu1 %449 }
 0x3f3   : > { %1231 = vrcp.f32 %v450_v23 }
 0x3f7   : > { %v590_v24 = vpop.xlane.xlu0 %589 }
 0x3f8   : > { %1233 = vrcp.f32 %v590_v24 }
 0x3fb   : > { %v735_v25 = vpop.xlane.xlu1 %734  ;;  %v879_v26 = vpop.xlane.xlu0 %878 }
 0x3fc   : > { %1235 = vrcp.f32 %v735_v25 }
 0x3fd   : > { %v1232_v27 = vpop.eup %1231  ;;  %1237 = vrcp.f32 %v879_v26 }
 0x3fe   : > { %v452_v28 = vmul.f32 %v1232_v27, %v1224_v14 }
 0x3ff   : > { %v746_v29 = vpop.permute.xlu0 %745  ;;  %v890_v31 = vpop.permute.xlu1 %889 }
 0x400   : > { %1150 = vmatmul.mubr.msk.f32.vlgmr.msra.gmra.mrb[2].mxu0 %vm441_vm4, %v452_v28 }
 0x401   : > { %1158 = vmatpush3.msra.mxu0 %v746_v29  ;;  %1159 = vmatprep.mubr.msk.f32.mxu0 %vm1264_vm0, %v1265_v6 }
 0x402   : > { %v1234_v30 = vpop.eup %1233 }
 0x403   : > { %v592_v15 = vmul.f32 %v1234_v30, %v1226_v17 }
 0x405   : > { %1155 = vmatmul.mubr.msk.f32.vlgmr.msra.gmra.mrb[2].mxu1 %vm441_vm4, %v592_v15 }
 0x406   : > { %v1236_v32 = vpop.eup %1235  ;;  %1163 = vmatpush3.msra.mxu1 %v890_v31  ;;  %1164 = vmatprep.mubr.msk.f32.mxu1 %vm1264_vm0, %v1265_v6 }
 0x407   : > { %v1238_v33 = vpop.eup %1237  ;;  %v737_v34 = vmul.f32 %v1236_v32, %v1230_v20 }
 0x408   : > { %v881_v35 = vmul.f32 %v1238_v33, %v1228_v19 }
 0x409   : > { %1160 = vmatmul.mubr.msk.f32.vlgmr.msra.gmra.mrb[4].mxu0 %vm441_vm4, %v737_v34 }
 0x40a   : > { %1165 = vmatmul.mubr.msk.f32.vlgmr.msra.gmra.mrb[4].mxu1 %vm441_vm4, %v881_v35 }
 0x4d3   : > { %v529_v37 = vpop.f32.mrb[2].mxu0 }
 0x4d4   : > { %v530_v38 = vadd.f32 %v1092_v36, %v529_v37  ;;  %v1151_v39 = vpop.f32.mrb[3].mxu0 }
 0x4d6   : > { %533 = vst.msk [vmem:[%s224_s20] sm:$0xff] %vm441_vm4, %v530_v38 }
 0x4d8   : > { %v673_v6 = vpop.f32.mrb[2].mxu1 }
 0x4d9   : > { %v674_v40 = vadd.f32 %v1092_v36, %v673_v6  ;;  %v1156_v41 = vpop.f32.mrb[3].mxu1 }
 0x4da   : > { %973 = sbr.rel (!%p1332_p4) target bundleno = 1257 (0x4e9), region = 44 }
 0x4db   : > { %1096 = vst.msk [vmem:[%s224_s20 + $0x8] sm:$0xff] %vm441_vm4, %v674_v40 }
 0x4dc   : > { %v817_v42 = vpop.f32.mrb[4].mxu0 }
 0x4dd   : > { %v818_v43 = vadd.f32 %v1092_v36, %v817_v42  ;;  %v961_v44 = vpop.f32.mrb[4].mxu1  ;;  %v1161_v45 = vpop.f32.mrb[5].mxu0  ;;  %v1009_v48 = vld [vmem:[%s224_s20] sm:$0xff] (%p1332_p4) }
 0x4de   : > { %v962_v46 = vadd.f32 %v1092_v36, %v961_v44  ;;  %v1166_v47 = vpop.f32.mrb[5].mxu1  ;;  %1010 = vst [vmem:[%s975_s27] sm:$0xff] (%p1332_p4), %v1009_v48 }
 0x4df   : > { %1099 = vst.msk [vmem:[%s224_s20 + $0x10] sm:$0xff] %vm441_vm4, %v818_v43 }
 0x4e0   : > { %1102 = vst.msk [vmem:[%s224_s20 + $0x18] sm:$0xff] %vm441_vm4, %v962_v46 }
 0x4e2   : > { %v1011_v49 = vld [vmem:[%s224_s20 + $0x8] sm:$0xff] }
 0x4e3   : > { %1012 = vst [vmem:[%s975_s27 + $0x10] sm:$0xff] %v1011_v49 }
 0x4e6   : > { %v1013_v50 = vld [vmem:[%s224_s20 + $0x10] sm:$0xff] }
 0x4e7   : > { %v1015_v51 = vld [vmem:[%s224_s20 + $0x18] sm:$0xff]  ;;  %1014 = vst [vmem:[%s975_s27 + $0x20] sm:$0xff] %v1013_v50 }
 0x4e8   : > { %1016 = vst [vmem:[%s975_s27 + $0x30] sm:$0xff] %v1015_v51 }
 0x4e9 PF: > { %p12_p8 = scmp.ge.s32.totalorder %s1322_s22, 4   ;;  %s1447_s18 = smov %s1257_s19 }
 0x4ea   : > { %s1448_s19 = smov %s1330_s25  ;;  %s1449_s20 = smov %s1322_s22 }
 0x4eb   :  { %14 = sbr.rel (!%p12_p8) target bundleno = 2 (0x2), region = 114 }

// kernel: emotion_cause_pair_extractor_forward.3
= control target key start
LH: loop header
LB: loop body
LE: loop exit
PB: predicated region body
PF: predicated region fallthrough
CT: control target
= control target key end

     0   :  { %s1681_s13 = smov 0   ;;  %s2149_s0 = inlined_call_operand.vmem [shape: f32[2,8,32], index: 0, kind: input, shape index: {}]   ;;  %s2150_s1 = inlined_call_operand.vmem [shape: f32[2,8,32], index: 1, kind: input, shape index: {}]   ;;  %s2151_s2 = inlined_call_operand.vmem [shape: f32[32,32], index: 2, kind: input, shape index: {}]   ;;  %s2152_s3 = inlined_call_operand.vmem [shape: f32[1,32], index: 3, kind: input, shape index: {}]   ;;  %s2153_s4 = inlined_call_operand.vmem [shape: f32[32,768], index: 4, kind: input, shape index: {}]   ;;  %s2154_s5 = inlined_call_operand.vmem [shape: f32[1,768], index: 5, kind: input, shape index: {}]   ;;  %s2155_s6 = inlined_call_operand.vmem [shape: f32[768,2], index: 6, kind: input, shape index: {}]   ;;  %s2156_s7 = inlined_call_operand.vmem [shape: f32[32,2], index: 7, kind: input, shape index: {}]   ;;  %s2157_s8 = inlined_call_operand.vmem [shape: f32[1,3], index: 8, kind: input, shape index: {}]   ;;  %s2158_s9 = inlined_call_operand.vmem [shape: f32[2,8,2], index: 9, kind: output, shape index: {0}]   ;;  %s2159_s10 = inlined_call_operand.vmem [shape: f32[2,8,8], index: 10, kind: output, shape index: {1}]  }
   0x1 LB: > { %s1300_s14 = sadd.s32 4294967295, %s1618_s13   ;;  %p1304_p0 = scmp.ge.s32.totalorder %s1618_s13, 1  ;;  %s1618_s13 = sphi %s1681_s13, %s21_s13  }
   0x2   : > { %p323_p1 = scmp.lt.s32.totalorder %s1618_s13, 3 }
   0x4   : > { %p324_p2 = pnand %p1304_p0, %p323_p1 }
   0x5   : > { %v391_v0 = vld [vmem:[%s2151_s2] sm:$0xff] (!%p324_p2)  ;;  %v392_v1 = vld [vmem:[%s2151_s2 + $0x8] sm:$0xff] (!%p324_p2)  ;;  %v393_v2 = vld [vmem:[%s2151_s2 + $0x10] sm:$0xff] (!%p324_p2)  ;;  %v1620_v3 = vmov (!%p324_p2), 0.0|0.0   ;;  %vm1621_vm0 = vmmov (!%p324_p2), 0   ;;  %v1622_v6 = vmov (!%p324_p2), 0.0  }
   0x6   : > { %327 = sbr.rel (%p324_p2) target bundleno = 952 (0x3b8), region = 56  ;;  %1457 = vmatprep.subr.bf16.mxu1 (!%p324_p2), %v1620_v3  ;;  %v1458_v4 = vpack.c.bf16 (!%p324_p2), %v392_v1, %v391_v0  ;;  %v394_v5 = vld [vmem:[%s2151_s2 + $0x18] sm:$0xff] (!%p324_p2)  ;;  %1443 = vmatprep.mubr.msk.f32.mxu1 (!%p324_p2), %vm1621_vm0, %v1622_v6  ;;  %p367_p3 = scmp.lt.s32.totalorder (!%p324_p2), %s1300_s14, 1  ;;  %vm402_vm1 = vcmask (!%p324_p2), 261120   ;;  %v486_v9 = vld [vmem:[%s2153_s4 + $0x8] sm:$0xff] (!%p324_p2)  ;;  %v485_v11 = vld [vmem:[%s2153_s4] sm:$0xff] (!%p324_p2) }
   0x7   : > { %679 = vmatprep.mubr.f32.mxu0 (!%p324_p2), %v1622_v6  ;;  %v1461_v7 = vpack.c.bf16 (!%p324_p2), %v394_v5, %v393_v2  ;;  %v492_v10 = vld [vmem:[%s2153_s4 + $0x38] sm:$0xff] (!%p324_p2)  ;;  %v491_v13 = vld [vmem:[%s2153_s4 + $0x30] sm:$0xff] (!%p324_p2)  ;;  %v494_v15 = vld [vmem:[%s2153_s4 + $0x48] sm:$0xff] (!%p324_p2)  ;;  %s1625_s12 = smov (!%p324_p2), 127   ;;  %vm1070_vm3 = vcmask (!%p324_p2), 15360   ;;  %vm1202_vm4 = vcmask (!%p324_p2), 64512  }
   0x8   : > { %1459 = vmatpush3.bf16.msra.mxu1 (!%p324_p2), %v1458_v4  ;;  %v1463_v12 = vpack.c.bf16 (!%p324_p2), %v492_v10, %v486_v9  ;;  %v488_v14 = vld [vmem:[%s2153_s4 + $0x18] sm:$0xff] (!%p324_p2)  ;;  %v1465_v16 = vpack.c.bf16 (!%p324_p2), %v491_v13, %v485_v11  ;;  %v487_v18 = vld [vmem:[%s2153_s4 + $0x10] sm:$0xff] (!%p324_p2)  ;;  %v493_v19 = vld [vmem:[%s2153_s4 + $0x40] sm:$0xff] (!%p324_p2) }
   0x9   : > { %1460 = vmatprep.subr.bf16.mxu1 (!%p324_p2), %v1620_v3  ;;  %v1471_v17 = vpack.c.bf16 (!%p324_p2), %v494_v15, %v488_v14  ;;  %v498_v20 = vld [vmem:[%s2153_s4 + $0x68] sm:$0xff] (!%p324_p2)  ;;  %v1473_v21 = vpack.c.bf16 (!%p324_p2), %v493_v19, %v487_v18  ;;  %v504_v22 = vld [vmem:[%s2153_s4 + $0x98] sm:$0xff] (!%p324_p2)  ;;  %v497_v23 = vld [vmem:[%s2153_s4 + $0x60] sm:$0xff] (!%p324_p2) }
   0xa   : > { %v503_v24 = vld [vmem:[%s2153_s4 + $0x90] sm:$0xff] (!%p324_p2)  ;;  %v1467_v25 = vpack.c.bf16 (!%p324_p2), %v504_v22, %v498_v20  ;;  %v500_v27 = vld [vmem:[%s2153_s4 + $0x78] sm:$0xff] (!%p324_p2)  ;;  %v506_v28 = vld [vmem:[%s2153_s4 + $0xa8] sm:$0xff] (!%p324_p2) }
   0xb   : > { %1472 = vmatprep.subr.bf16.mxu0 (!%p324_p2), %v1471_v17  ;;  %v1469_v26 = vpack.c.bf16 (!%p324_p2), %v503_v24, %v497_v23  ;;  %v499_v29 = vld [vmem:[%s2153_s4 + $0x70] sm:$0xff] (!%p324_p2)  ;;  %v1475_v30 = vpack.c.bf16 (!%p324_p2), %v506_v28, %v500_v27  ;;  %v505_v31 = vld [vmem:[%s2153_s4 + $0xa0] sm:$0xff] (!%p324_p2)  ;;  %v490_v32 = vld [vmem:[%s2153_s4 + $0x28] sm:$0xff] (!%p324_p2) }
   0xc   : > { %1462 = vmatpush3.bf16.msra.mxu1 (!%p324_p2), %v1461_v7  ;;  %1474 = vmatpush1.bf16.msra.mxu0 (!%p324_p2), %v1473_v21  ;;  %v496_v33 = vld [vmem:[%s2153_s4 + $0x58] sm:$0xff] (!%p324_p2)  ;;  %v1477_v34 = vpack.c.bf16 (!%p324_p2), %v505_v31, %v499_v29  ;;  %v773_v36 = vld [vmem:[%s2155_s6 + $0x80] sm:$0xff] (!%p324_p2)  ;;  %v774_v37 = vld [vmem:[%s2155_s6 + $0x88] sm:$0xff] (!%p324_p2) }
   0xd   : > { %s2161_s14 = smov (!%p367_p3, %s1300_s14), 1  ;;  %1464 = vmatprep.subr.bf16.mxu1 %v1463_v12  ;;  %v1479_v35 = vpack.c.bf16 %v496_v33, %v490_v32  ;;  %1476 = vmatprep.subr.bf16.mxu0 %v1475_v30  ;;  %v1487_v38 = vpack.c.bf16 %v774_v37, %v773_v36  ;;  %v1310_v39 = vld [vmem:[%s2152_s3] ss:$0 sm:$0xff]  ;;  %v495_v56 = vld [vmem:[%s2153_s4 + $0x50] sm:$0xff]  ;;  %v502_v57 = vld [vmem:[%s2153_s4 + $0x88] sm:$0xff] }
   0xe   : > { %s1706_s23 = sshll.u32 %s2161_s14, 3  ;;  %v489_v55 = vld [vmem:[%s2153_s4 + $0x20] sm:$0xff]  ;;  %v508_v58 = vld [vmem:[%s2153_s4 + $0xb8] sm:$0xff]  ;;  %v758_v60 = vld [vmem:[%s2155_s6 + $0x8] sm:$0xff] }
   0xf   : > { %s370_s26 = scalar_lea.vmem %s2149_s0, %s1706_s23  ;;  %s374_s16 = scalar_lea.vmem %s2150_s1, %s1706_s23  ;;  %v757_v59 = vld [vmem:[%s2155_s6] sm:$0xff]  ;;  %v775_v63 = vld [vmem:[%s2155_s6 + $0x90] sm:$0xff]  ;;  %v776_v0 = vld [vmem:[%s2155_s6 + $0x98] sm:$0xff]  ;;  %v1481_v1 = vpack.c.bf16 %v495_v56, %v489_v55  ;;  %v1483_v4 = vpack.c.bf16 %v508_v58, %v502_v57 }
  0x10   : > { %v1712_v8 = vld [vmem:[%s370_s26] sm:$0xff]  ;;  %1478 = vmatpush1.bf16.msra.mxu0 %v1477_v34  ;;  %v507_v7 = vld [vmem:[%s2153_s4 + $0xb0] sm:$0xff]  ;;  %v1489_v9 = vpack.c.bf16 %v758_v60, %v757_v59  ;;  %v806_v10 = vld [vmem:[%s2155_s6 + $0x188] sm:$0xff]  ;;  %v1491_v11 = vpack.c.bf16 %v776_v0, %v775_v63  ;;  %s382_s19 = scalar_lea.vmem %s2159_s10, %s1706_s23 }
  0x11   : > { %1444 = vmatmul.mubr.msk.f32.vlgmr.msra.gmra.mrb[0].mxu1 %vm402_vm1, %v1712_v8  ;;  %1488 = vmatprep.subr.bf16.mxu0 %v1487_v38  ;;  %v384_v43 = vld [vmem:[%s374_s16] sm:$0xff]  ;;  %v759_v12 = vld [vmem:[%s2155_s6 + $0x10] sm:$0xff]  ;;  %v760_v13 = vld [vmem:[%s2155_s6 + $0x18] sm:$0xff]  ;;  %s378_s16 = scalar_lea.vmem %s2158_s9, %s1706_s23 }
  0x12   : > { %608 = vmatprep.mubr.f32.mxu1 %v1622_v6  ;;  %1466 = vmatpush1.bf16.msra.mxu1 %v1465_v16  ;;  %v386_v45 = vmin.f32 %v384_v43, 0.0  ;;  %vm385_vm2 = vcmp.gt.f32.partialorder %v384_v43, 0.0  ;;  %v501_v5 = vld [vmem:[%s2153_s4 + $0x80] sm:$0xff]  ;;  %v778_v15 = vld [vmem:[%s2155_s6 + $0xa8] sm:$0xff]  ;;  %v807_v20 = vld [vmem:[%s2155_s6 + $0x190] sm:$0xff]  ;;  %v1493_v21 = vpack.c.bf16 %v760_v13, %v759_v12 }
  0x13   : > { %1468 = vmatprep.subr.bf16.mxu1 %v1467_v25  ;;  %v777_v14 = vld [vmem:[%s2155_s6 + $0xa0] sm:$0xff]  ;;  %v1485_v16 = vpack.c.bf16 %v507_v7, %v501_v5  ;;  %v790_v19 = vld [vmem:[%s2155_s6 + $0x108] sm:$0xff]  ;;  %v808_v22 = vld [vmem:[%s2155_s6 + $0x198] sm:$0xff] }
  0x14   : > { %v387_v47 = vmul.f32 1.442695, %v386_v45  ;;  %v789_v18 = vld [vmem:[%s2155_s6 + $0x100] sm:$0xff]  ;;  %v1495_v23 = vpack.c.bf16 %v778_v15, %v777_v14  ;;  %v762_v25 = vld [vmem:[%s2155_s6 + $0x28] sm:$0xff]  ;;  %v780_v27 = vld [vmem:[%s2155_s6 + $0xb8] sm:$0xff]  ;;  %v1523_v29 = vpack.c.bf16 %v808_v22, %v807_v20 }
  0x15   : > { %v761_v24 = vld [vmem:[%s2155_s6 + $0x20] sm:$0xff]  ;;  %v1521_v28 = vpack.c.bf16 %v790_v19, %v789_v18  ;;  %v791_v30 = vld [vmem:[%s2155_s6 + $0x110] sm:$0xff]  ;;  %v792_v31 = vld [vmem:[%s2155_s6 + $0x118] sm:$0xff] }
  0x16   : > { %1470 = vmatpush1.bf16.msra.mxu1 %v1469_v26  ;;  %v779_v26 = vld [vmem:[%s2155_s6 + $0xb0] sm:$0xff]  ;;  %v809_v32 = vld [vmem:[%s2155_s6 + $0x1a0] sm:$0xff]  ;;  %v1497_v33 = vpack.c.bf16 %v762_v25, %v761_v24  ;;  %v810_v34 = vld [vmem:[%s2155_s6 + $0x1a8] sm:$0xff] }
  0x17   : > { %1480 = vmatprep.subr.bf16.mxu1 %v1479_v35  ;;  %v1499_v35 = vpack.c.bf16 %v780_v27, %v779_v26  ;;  %v763_v36 = vld [vmem:[%s2155_s6 + $0x30] sm:$0xff]  ;;  %v764_v37 = vld [vmem:[%s2155_s6 + $0x38] sm:$0xff]  ;;  %v781_v38 = vld [vmem:[%s2155_s6 + $0xc0] sm:$0xff] }
  0x18   : > { %v1501_v45 = vpack.c.bf16 %v764_v37, %v763_v36  ;;  %v796_v55 = vld [vmem:[%s2155_s6 + $0x138] sm:$0xff]  ;;  %v813_v56 = vld [vmem:[%s2155_s6 + $0x1c0] sm:$0xff]  ;;  %v814_v58 = vld [vmem:[%s2155_s6 + $0x1c8] sm:$0xff] }
  0x19   : > { %v767_v60 = vld [vmem:[%s2155_s6 + $0x50] sm:$0xff]  ;;  %v786_v63 = vld [vmem:[%s2155_s6 + $0xe8] sm:$0xff]  ;;  %v817_v18 = vld [vmem:[%s2155_s6 + $0x1e0] sm:$0xff] }
  0x1a   : > { %v798_v5 = vld [vmem:[%s2155_s6 + $0x148] sm:$0xff]  ;;  %v815_v7 = vld [vmem:[%s2155_s6 + $0x1d0] sm:$0xff]  ;;  %v801_v22 = vld [vmem:[%s2155_s6 + $0x160] sm:$0xff] }
  0x1b   : > { %v770_v12 = vld [vmem:[%s2155_s6 + $0x68] sm:$0xff]  ;;  %v799_v15 = vld [vmem:[%s2155_s6 + $0x150] sm:$0xff]  ;;  %v788_v26 = vld [vmem:[%s2155_s6 + $0xf8] sm:$0xff] }
  0x1c   : > { %v818_v19 = vld [vmem:[%s2155_s6 + $0x1e8] sm:$0xff]  ;;  %v787_v25 = vld [vmem:[%s2155_s6 + $0xf0] sm:$0xff]  ;;  %v837_v37 = vld [vmem:[%s2155_s6 + $0x280] sm:$0xff] }
  0x1d   : > { %v819_v27 = vld [vmem:[%s2155_s6 + $0x1f0] sm:$0xff] }
  0xe4   : > { %v472_v40 = vpop.f32.mrb[0].mxu1 }
  0xe5   : > { %v473_v41 = vadd.f32 %v1310_v39, %v472_v40  ;;  %v1445_v42 = vpop.f32.mrb[1].mxu1  ;;  %v782_v39 = vld [vmem:[%s2155_s6 + $0xc8] sm:$0xff]  ;;  %v1525_v40 = vpack.c.bf16 %v792_v31, %v791_v30  ;;  %v771_v30 = vld [vmem:[%s2155_s6 + $0x70] sm:$0xff]  ;;  %v772_v31 = vld [vmem:[%s2155_s6 + $0x78] sm:$0xff] }
  0xe6   : > { %v793_v42 = vld [vmem:[%s2155_s6 + $0x120] sm:$0xff] }
  0xe7   : > { %v476_v44 = vsub.f32 0.0, %v473_v41  ;;  %v1527_v41 = vpack.c.bf16 %v810_v34, %v809_v32  ;;  %v803_v34 = vld [vmem:[%s2155_s6 + $0x170] sm:$0xff] }
  0xe9   : > { %v477_v46 = vmul.f32 1.442695, %v476_v44  ;;  %v811_v44 = vld [vmem:[%s2155_s6 + $0x1b0] sm:$0xff] }
  0xeb   : > { %1606 = vpow2.f32 %v477_v46  ;;  %v812_v46 = vld [vmem:[%s2155_s6 + $0x1b8] sm:$0xff] }
  0xec   : > { %1608 = vpow2.f32 %v387_v47  ;;  %v1503_v47 = vpack.c.bf16 %v782_v39, %v781_v38  ;;  %v838_v38 = vld [vmem:[%s2155_s6 + $0x288] sm:$0xff] }
  0xed   : > { %v1551_v39 = vpack.c.bf16 %v838_v38, %v837_v37  ;;  %v832_v37 = vld [vmem:[%s2155_s6 + $0x258] sm:$0xff]  ;;  %v849_v38 = vld [vmem:[%s2155_s6 + $0x2e0] sm:$0xff] }
  0xf5   : > { %v1607_v48 = vpop.eup %1606 }
  0xf6   : > { %v479_v49 = vadd.f32 1.0, %v1607_v48  ;;  %v1609_v50 = vpop.eup %1608  ;;  %v765_v48 = vld [vmem:[%s2155_s6 + $0x40] sm:$0xff] }
  0xf7   : > { %v1309_v51 = vadd.f32 -1.0, %v1609_v50  ;;  %v783_v50 = vld [vmem:[%s2155_s6 + $0xd0] sm:$0xff] }
  0xf8   : > { %1610 = vrcp.f32 %v479_v49  ;;  %v766_v49 = vld [vmem:[%s2155_s6 + $0x48] sm:$0xff] }
  0xf9   : > { %v390_v53 = vsel %vm385_vm2, %v384_v43, %v1309_v51  ;;  %v794_v43 = vld [vmem:[%s2155_s6 + $0x128] sm:$0xff]  ;;  %v784_v51 = vld [vmem:[%s2155_s6 + $0xd8] sm:$0xff]  ;;  %v1505_v57 = vpack.c.bf16 %v766_v49, %v765_v48  ;;  %v821_v49 = vld [vmem:[%s2155_s6 + $0x200] sm:$0xff] }
  0xfa   : > { %v1507_v59 = vpack.c.bf16 %v784_v51, %v783_v50  ;;  %v822_v50 = vld [vmem:[%s2155_s6 + $0x208] sm:$0xff] }
 0x102   : > { %v1611_v52 = vpop.eup %1610 }
 0x103   : > { %v482_v54 = vsub.f32 1.0, %v1611_v52  ;;  %v481_v61 = vmul.f32 %v1611_v52, %v390_v53  ;;  %v1529_v52 = vpack.c.bf16 %v794_v43, %v793_v42  ;;  %v1531_v53 = vpack.c.bf16 %v812_v46, %v811_v44  ;;  %v2012_v44 = vld [vmem:[%s2154_s5] sm:$0x3f] }
 0x105   : > { %v483_v62 = vmul.f32 %v482_v54, %v1712_v8  ;;  %v805_v8 = vld [vmem:[%s2155_s6 + $0x180] sm:$0xff]  ;;  %v795_v54 = vld [vmem:[%s2155_s6 + $0x130] sm:$0xff] }
 0x106   : > { %v1519_v17 = vpack.c.bf16 %v806_v10, %v805_v8  ;;  %v1533_v0 = vpack.c.bf16 %v796_v55, %v795_v54  ;;  %v1073_v54 = vld [vmem:[%s2156_s7 + $0x8] sm:$0xff] }
 0x107   : > { %v1809_v2 = vadd.f32 %v483_v62, %v481_v61  ;;  %v768_v61 = vld [vmem:[%s2155_s6 + $0x58] sm:$0xff]  ;;  %v785_v62 = vld [vmem:[%s2155_s6 + $0xe0] sm:$0xff] }
 0x108   : > { %v1509_v8 = vpack.c.bf16 %v768_v61, %v767_v60  ;;  %v1511_v10 = vpack.c.bf16 %v786_v63, %v785_v62  ;;  %v1553_v61 = vpack.c.bf16 %v822_v50, %v821_v49 }
 0x109   : > { %1312 = vmatmul.mubr.msk.f32.vlgmr.msra.gmra.mrb[2].mxu1 %vm402_vm1, %v1809_v2  ;;  %1313 = vmatmul.mubr.msk.f32.vlgmr.msra.gmra.mrb[0].mxu0 %vm402_vm1, %v1809_v2 }
 0x10a   : > { %1482 = vmatpush1.bf16.msra.mxu1 %v1481_v1  ;;  %750 = vmatprep.mubr.f32.mxu1 %v1622_v6  ;;  %v1535_v1 = vpack.c.bf16 %v814_v58, %v813_v56  ;;  %v840_v58 = vld [vmem:[%s2155_s6 + $0x298] sm:$0xff] }
 0x10b   : > { %1484 = vmatprep.subr.bf16.mxu1 %v1483_v4  ;;  %1490 = vmatpush3.bf16.msra.mxu0 %v1489_v9  ;;  %v797_v4 = vld [vmem:[%s2155_s6 + $0x140] sm:$0xff]  ;;  %v816_v9 = vld [vmem:[%s2155_s6 + $0x1d8] sm:$0xff] }
 0x10c   : > { %1492 = vmatprep.subr.bf16.mxu0 %v1491_v11  ;;  %v769_v11 = vld [vmem:[%s2155_s6 + $0x60] sm:$0xff]  ;;  %v1537_v13 = vpack.c.bf16 %v798_v5, %v797_v4  ;;  %v1539_v14 = vpack.c.bf16 %v816_v9, %v815_v7  ;;  %v823_v4 = vld [vmem:[%s2155_s6 + $0x210] sm:$0xff]  ;;  %v824_v9 = vld [vmem:[%s2155_s6 + $0x218] sm:$0xff] }
 0x10e   : > { %1486 = vmatpush1.bf16.msra.mxu1 %v1485_v16  ;;  %v800_v16 = vld [vmem:[%s2155_s6 + $0x158] sm:$0xff] }
 0x10f   : > { %1520 = vmatprep.subr.bf16.mxu1 %v1519_v17  ;;  %1494 = vmatpush3.bf16.msra.mxu0 %v1493_v21  ;;  %v1513_v17 = vpack.c.bf16 %v770_v12, %v769_v11  ;;  %v1541_v20 = vpack.c.bf16 %v800_v16, %v799_v15  ;;  %v1543_v21 = vpack.c.bf16 %v818_v19, %v817_v18  ;;  %v1075_v11 = vld [vmem:[%s2156_s7 + $0x18] sm:$0xff]  ;;  %v841_v12 = vld [vmem:[%s2155_s6 + $0x2a0] sm:$0xff]  ;;  %v826_v19 = vld [vmem:[%s2155_s6 + $0x228] sm:$0xff] }
 0x110   : > { %1496 = vmatprep.subr.bf16.mxu0 %v1495_v23  ;;  %v802_v23 = vld [vmem:[%s2155_s6 + $0x168] sm:$0xff]  ;;  %v1557_v15 = vpack.c.bf16 %v824_v9, %v823_v4  ;;  %v825_v18 = vld [vmem:[%s2155_s6 + $0x220] sm:$0xff] }
 0x111   : > { %1314 = vmatmul.mubr.msk.f32.vlgmr.msra.gmra.mrb[4].mxu1 %vm402_vm1, %v1809_v2  ;;  %v1545_v24 = vpack.c.bf16 %v802_v23, %v801_v22 }
 0x112   : > { %1522 = vmatpush3.bf16.msra.mxu1 %v1521_v28  ;;  %v1515_v28 = vpack.c.bf16 %v788_v26, %v787_v25  ;;  %v827_v26 = vld [vmem:[%s2155_s6 + $0x230] sm:$0xff] }
 0x113   : > { %1524 = vmatprep.subr.bf16.mxu1 %v1523_v29  ;;  %1498 = vmatpush3.bf16.msra.mxu0 %v1497_v33  ;;  %v820_v29 = vld [vmem:[%s2155_s6 + $0x1f8] sm:$0xff]  ;;  %v1517_v33 = vpack.c.bf16 %v772_v31, %v771_v30  ;;  %v829_v31 = vld [vmem:[%s2155_s6 + $0x240] sm:$0xff] }
 0x114   : > { %1500 = vmatprep.subr.bf16.mxu0 %v1499_v35  ;;  %v1547_v32 = vpack.c.bf16 %v820_v29, %v819_v27  ;;  %v804_v35 = vld [vmem:[%s2155_s6 + $0x178] sm:$0xff]  ;;  %v845_v27 = vld [vmem:[%s2155_s6 + $0x2c0] sm:$0xff] }
 0x115   : > { %v1549_v36 = vpack.c.bf16 %v804_v35, %v803_v34 }
 0x116   : > { %1526 = vmatpush3.bf16.msra.mxu1 %v1525_v40  ;;  %v511_v40 = vlaneseq }
 0x117   : > { %1528 = vmatprep.subr.bf16.mxu1 %v1527_v41  ;;  %1502 = vmatpush3.bf16.msra.mxu0 %v1501_v45 }
 0x118   : > { %1504 = vmatprep.subr.bf16.mxu0 %v1503_v47  ;;  %v2005_v41 = vshrl.u32 %v511_v40, 7 }
 0x11a   : > { %1530 = vmatpush3.bf16.msra.mxu1 %v1529_v52  ;;  %v517_v42 = vsub.s32 1, %v2005_v41  ;;  %v525_v43 = vsub.s32 3, %v2005_v41  ;;  %v513_v45 = vsub.s32 0, %v2005_v41  ;;  %v521_v46 = vsub.s32 2, %v2005_v41 }
 0x11b   : > { %1532 = vmatprep.subr.bf16.mxu1 %v1531_v53  ;;  %1506 = vmatpush3.bf16.msra.mxu0 %v1505_v57  ;;  %v1072_v53 = vld [vmem:[%s2156_s7] sm:$0xff]  ;;  %v839_v57 = vld [vmem:[%s2155_s6 + $0x290] sm:$0xff]  ;;  %v529_v50 = vsub.s32 4, %v2005_v41 }
 0x11c   : > { %1508 = vmatprep.subr.bf16.mxu0 %v1507_v59  ;;  %v518_v47 = vrot.slane %v2012_v44, %v517_v42  ;;  %v526_v48 = vrot.slane %v2012_v44, %v525_v43  ;;  %v514_v51 = vrot.slane %v2012_v44, %v513_v45  ;;  %v522_v52 = vrot.slane %v2012_v44, %v521_v46  ;;  %v833_v43 = vld [vmem:[%s2155_s6 + $0x260] sm:$0xff]  ;;  %v834_v46 = vld [vmem:[%s2155_s6 + $0x268] sm:$0xff] }
 0x11d   : > { %v1577_v49 = vpack.c.bf16 %v834_v46, %v833_v43 }
 0x11e   : > { %1534 = vmatpush3.bf16.msra.mxu1 %v1533_v0  ;;  %v1584_v0 = vpack.c.bf16 %v1073_v54, %v1072_v53  ;;  %v836_v53 = vld [vmem:[%s2155_s6 + $0x278] sm:$0xff] }
 0x11f   : > { %1536 = vmatprep.subr.bf16.mxu1 %v1535_v1  ;;  %1510 = vmatpush3.bf16.msra.mxu0 %v1509_v8  ;;  %v533_v1 = vsub.s32 5, %v2005_v41  ;;  %v1555_v8 = vpack.c.bf16 %v840_v58, %v839_v57  ;;  %v1623_v57 = vmov 0   ;;  %v1315_v58 = vld [vmem:[%s2157_s8] ss:$0 sm:$0xff] }
 0x120   : > { %1512 = vmatprep.subr.bf16.mxu0 %v1511_v10  ;;  %v1074_v10 = vld [vmem:[%s2156_s7 + $0x10] sm:$0xff]  ;;  %1603 = vset.pattern.permute.xlu0 %v1623_v57 }
 0x121   : > { %v1587_v16 = vpack.c.bf16 %v1075_v11, %v1074_v10 }
 0x122   : > { %1538 = vmatpush3.bf16.msra.mxu1 %v1537_v13  ;;  %v842_v13 = vld [vmem:[%s2155_s6 + $0x2a8] sm:$0xff] }
 0x123   : > { %1540 = vmatprep.subr.bf16.mxu1 %v1539_v14  ;;  %1514 = vmatpush3.bf16.msra.mxu0 %v1513_v17  ;;  %v534_v14 = vrot.slane %v2012_v44, %v533_v1  ;;  %v1559_v17 = vpack.c.bf16 %v842_v13, %v841_v12 }
 0x124   : > { %1516 = vmatprep.subr.bf16.mxu0 %v1515_v28  ;;  %v846_v28 = vld [vmem:[%s2155_s6 + $0x2c8] sm:$0xff] }
 0x125   : > { %v1567_v30 = vpack.c.bf16 %v846_v28, %v845_v27 }
 0x126   : > { %1542 = vmatpush3.bf16.msra.mxu1 %v1541_v20 }
 0x127   : > { %1544 = vmatprep.subr.bf16.mxu1 %v1543_v21  ;;  %1518 = vmatpush3.bf16.msra.mxu0 %v1517_v33  ;;  %v843_v21 = vld [vmem:[%s2155_s6 + $0x2b0] sm:$0xff] }
 0x128   : > { %1552 = vmatprep.subr.bf16.mxu0 %v1551_v39  ;;  %v847_v33 = vld [vmem:[%s2155_s6 + $0x2d0] sm:$0xff]  ;;  %v850_v39 = vld [vmem:[%s2155_s6 + $0x2e8] sm:$0xff] }
 0x129   : > { %v1575_v42 = vpack.c.bf16 %v850_v39, %v849_v38 }
 0x12a   : > { %1546 = vmatpush3.bf16.msra.mxu1 %v1545_v24  ;;  %v1561_v24 = vpack.c.bf16 %v826_v19, %v825_v18 }
 0x12b   : > { %1548 = vmatprep.subr.bf16.mxu1 %v1547_v32  ;;  %v830_v32 = vld [vmem:[%s2155_s6 + $0x248] sm:$0xff] }
 0x12c   : > { %v1569_v34 = vpack.c.bf16 %v830_v32, %v829_v31 }
 0x12e   : > { %1550 = vmatpush3.bf16.msra.mxu1 %v1549_v36  ;;  %v831_v36 = vld [vmem:[%s2155_s6 + $0x250] sm:$0xff] }
 0x12f   : > { %1583 = vmatprep.subr.bf16.mxu1 %v1620_v3  ;;  %v1573_v40 = vpack.c.bf16 %v832_v37, %v831_v36 }
 0x1dc   : > { %v610_v55 = vpop.f32.mrb[2].mxu1  ;;  %v681_v56 = vpop.f32.mrb[0].mxu0 }
 0x1dd   : > { %v612_v59 = vpop.f32.mrb[3].mxu1  ;;  %v683_v60 = vpop.f32.mrb[1].mxu0  ;;  %v611_v5 = vadd.f32 %v610_v55, %v514_v51  ;;  %v682_v7 = vadd.f32 %v681_v56, %v522_v52  ;;  %v835_v52 = vld [vmem:[%s2155_s6 + $0x270] sm:$0xff]  ;;  %v530_v55 = vrot.slane %v2012_v44, %v529_v50 }
 0x1de   : > { %v613_v62 = vadd.f32 %v612_v59, %v518_v47  ;;  %v684_v63 = vadd.f32 %v683_v60, %v526_v48  ;;  %v851_v47 = vld [vmem:[%s2155_s6 + $0x2f0] sm:$0xff]  ;;  %v852_v48 = vld [vmem:[%s2155_s6 + $0x2f8] sm:$0xff]  ;;  %v1581_v54 = vpack.c.bf16 %v836_v53, %v835_v52  ;;  %v1624_v59 = vmov 2  }
 0x1df   : > { %v1579_v51 = vpack.c.bf16 %v852_v48, %v851_v47  ;;  %1604 = vset.pattern.permute.xlu1 %v1624_v59 }
 0x1e0   : > { %924 = vmatprep.mubr.f32.mxu0 %v613_v62  ;;  %994 = vmatprep.mubr.f32.mxu1 %v684_v63 }
 0x1e1   : > { %925 = vmatmul.mubr.f32.vlgmr.msra.gmra.mrb[2].mxu0 %v611_v5  ;;  %995 = vmatmul.mubr.f32.vlgmr.msra.gmra.mrb[6].mxu1 %v682_v7 }
 0x1e2   : > { %1554 = vmatpush3.bf16.msra.mxu0 %v1553_v61  ;;  %1585 = vmatpush3.bf16.msra.mxu1 %v1584_v0 }
 0x1e3   : > { %1556 = vmatprep.subr.bf16.mxu0 %v1555_v8  ;;  %1586 = vmatprep.subr.bf16.mxu1 %v1620_v3  ;;  %v844_v3 = vld [vmem:[%s2155_s6 + $0x2b8] sm:$0xff] }
 0x1e4   : > { %v752_v20 = vpop.f32.mrb[4].mxu1  ;;  %1454 = vmatprep.mubr.msk.f32.mxu1 %vm1621_vm0, %v1622_v6  ;;  %v1563_v25 = vpack.c.bf16 %v844_v3, %v843_v21  ;;  %v828_v6 = vld [vmem:[%s2155_s6 + $0x238] sm:$0xff]  ;;  %1198 = vperm.xlu1 %1604, %v1315_v58  }
 0x1e5   : > { %v754_v22 = vpop.f32.mrb[5].mxu1  ;;  %v1565_v29 = vpack.c.bf16 %v828_v6, %v827_v26  ;;  %v753_v56 = vadd.f32 %v752_v20, %v530_v55 }
 0x1e6   : > { %v755_v23 = vadd.f32 %v754_v22, %v534_v14  ;;  %1558 = vmatpush3.bf16.msra.mxu0 %v1557_v15  ;;  %1588 = vmatpush3.bf16.msra.mxu1 %v1587_v16 }
 0x1e7   : > { %1560 = vmatprep.subr.bf16.mxu0 %v1559_v17 }
 0x1e8   : > { %1064 = vmatprep.mubr.f32.mxu0 %v755_v23 }
 0x1e9   : > { %1455 = vmatmul.mubr.msk.f32.vlgmr.msra.gmra.mrb[8].mxu1 %vm402_vm1, %v1809_v2  ;;  %v848_v2 = vld [vmem:[%s2155_s6 + $0x2d8] sm:$0xff] }
 0x1ea   : > { %1562 = vmatpush3.bf16.msra.mxu0 %v1561_v24  ;;  %v1571_v35 = vpack.c.bf16 %v848_v2, %v847_v33 }
 0x1eb   : > { %1564 = vmatprep.subr.bf16.mxu0 %v1563_v25 }
 0x1ee   : > { %1566 = vmatpush3.bf16.msra.mxu0 %v1565_v29 }
 0x1ef   : > { %1568 = vmatprep.subr.bf16.mxu0 %v1567_v30 }
 0x1f2   : > { %1570 = vmatpush3.bf16.msra.mxu0 %v1569_v34 }
 0x1f3   : > { %1572 = vmatprep.subr.bf16.mxu0 %v1571_v35 }
 0x1f6   : > { %1574 = vmatpush3.bf16.msra.mxu0 %v1573_v40 }
 0x1f7   : > { %1576 = vmatprep.subr.bf16.mxu0 %v1575_v42 }
 0x1fa   : > { %1578 = vmatpush3.bf16.msra.mxu0 %v1577_v49 }
 0x1fb   : > { %1580 = vmatprep.subr.bf16.mxu0 %v1579_v51 }
 0x1fe   : > { %1582 = vmatpush3.bf16.msra.mxu0 %v1581_v54 }
 0x201   : > { %1065 = vmatmul.mubr.f32.vlgmr.msra.gmra.mrb[4].mxu0 %v753_v56 }
 0x263   : > { %v1199_v13 = vpop.permute.xlu1 %1198 }
 0x2b4   : > { %v1357_v60 = vpop.f32.mrb[2].mxu0  ;;  %v1392_v61 = vpop.f32.mrb[6].mxu1 }
 0x2b5   : > { %v1358_v62 = vpop.f32.mrb[3].mxu0  ;;  %v1393_v63 = vpop.f32.mrb[7].mxu1 }
 0x2b6   : > { %v1359_v0 = vadd.f32 %v1358_v62, %v1357_v60  ;;  %v1394_v44 = vadd.f32 %v1393_v63, %v1392_v61 }
 0x2b8   : > { %v927_v1 = vadd.f32 %v1359_v0, %v1315_v58 }
 0x2ba   : > { %v997_v4 = vadd.f32 %v1394_v44, %v927_v1 }
 0x2bc   : > { %v1142_v5 = vpop.f32.mrb[8].mxu1 }
 0x2bd   : > { %1147 = vrot.lane.b32.xlu0 %v1142_v5, %s1625_s12  ;;  %v1456_v7 = vpop.f32.mrb[9].mxu1 }
 0x2c1   : > { %1183 = vperm.xlu0 %1603, %v1142_v5  }
 0x2c5   : > { %1605 = vset.pattern.permute.xlu0 %v1624_v59 }
 0x2d4   : > { %v1427_v8 = vpop.f32.mrb[4].mxu0 }
 0x2d5   : > { %v1428_v9 = vpop.f32.mrb[5].mxu0 }
 0x2d6   : > { %v1429_v10 = vadd.f32 %v1428_v9, %v1427_v8 }
 0x2d8   : > { %v1067_v11 = vadd.f32 %v1429_v10, %v997_v4 }
 0x2da   : > { %1071 = vst.msk [vmem:[%s378_s16] sm:$0xff] %vm1070_vm3, %v1067_v11 }
 0x32f   : > { %v1148_v12 = vpop.permute.xlu0 %1147 }
 0x330   : > { %1150 = vxpose.xlu1.b32.start.end [1/1] (short) (narrow) %v1148_v12, 8 }
 0x340   : > { %v1184_v16 = vpop.permute.xlu0 %1183 }
 0x3b0   : > { %v1166_v14 = vpop.trf.xlu1 }
 0x3b1   : > { %v1189_v15 = vrot.slane %v1166_v14, %v513_v45 }
 0x3b3   : > { %v1190_v17 = vadd.f32 %v1189_v15, %v1184_v16 }
 0x3b5   : > { %v1201_v18 = vadd.f32 %v1199_v13, %v1190_v17 }
 0x3b7   : > { %1203 = vst.msk [vmem:[%s382_s19] sm:$0xff] %vm1202_vm4, %v1201_v18 }
 0x3b8 PF: > { %s21_s13 = sadd.s32 1, %s1618_s13  }
 0x3b9   : > { %p18_p4 = scmp.ge.s32.totalorder %s21_s13, 4  }
 0x3bb   :  { %20 = sbr.rel (!%p18_p4) target bundleno = 1 (0x1), region = 101 }

</bundles_post_ra>
